<compile_context>
chip_gen: v7x
topology: tpu7x:2x2x1
jax: 0.10.0
libtpu: 0.0.40
codegen_flags: <defaults>
</compile_context>

<pallas_src>
import math
import functools

import jax
import jax.numpy as jnp
from jax import lax
from jax.experimental import pallas as pl
from jax.experimental.pallas import tpu as pltpu


def _layernorm(x, gamma, beta, eps=1e-5):
    mu = jnp.mean(x, axis=-1, keepdims=True)
    var = jnp.mean((x - mu) ** 2, axis=-1, keepdims=True)
    return (x - mu) * lax.rsqrt(var + eps) * gamma + beta


# Batched matmul dim-numbers (leading head dim is the batch dim everywhere):
_PROJ = (((2,), (1,)), ((0,), (0,)))   # (H,M,K) x (H,K,N) -> (H,M,N)
_QKT = (((2,), (2,)), ((0,), (0,)))    # (H,M,K) x (H,N,K) -> (H,M,N)


def _bdot(a, b, dims):
    return lax.dot_general(a, b, dims, preferred_element_type=jnp.float32)


def decoder_block_kernel(enc_valid_ref,                 # scalar prefetch (B,) i32, SMEM
                         x_ref, enc_ref,                # (1,T,D), (1,Te,D)
                         wq1, wk1, wv1, wo1,            # (H,D,hd) x3, (H,hd,D)
                         wq2, wk2, wv2, wo2,            # (H,D,hd) x3, (H,hd,D)
                         wf1, bf1, wf2, bf2,            # (D,F),(1,F),(F,D),(1,D)
                         g1, b1, g2, b2, g3, b3,        # (1,D) each, f32
                         out_ref,                       # (1,tq,D)
                         k1_c, v1_c, k2_c, v2_c,        # VMEM caches (H,T,hd)/(H,Te,hd)
                         *, num_heads, tq, compute_dtype, approx_recip):
    b = pl.program_id(0)
    qi = pl.program_id(1)
    cdt = compute_dtype

    T = x_ref.shape[1]
    Te = enc_ref.shape[1]
    D = x_ref.shape[2]
    H = num_heads
    hd = D // H
    scale = 1.0 / math.sqrt(hd)

    # ---- Once per batch element (query-tile 0): project K/V for both
    #      attentions into VMEM scratch so later query tiles reuse them. ----
    @pl.when(qi == 0)
    def _():
        # TODO(synk): for very large T, fill the caches chunk-by-chunk to bound
        #             the (H, T, D) broadcast transient.
        xb = jnp.broadcast_to(x_ref[0].astype(cdt)[None], (H, T, D))
        k1_c[...] = _bdot(xb, wk1[...], _PROJ).astype(cdt)     # (H, T, hd)
        v1_c[...] = _bdot(xb, wv1[...], _PROJ).astype(cdt)
        eb = jnp.broadcast_to(enc_ref[0].astype(cdt)[None], (H, Te, D))
        k2_c[...] = _bdot(eb, wk2[...], _PROJ).astype(cdt)     # (H, Te, hd)
        v2_c[...] = _bdot(eb, wv2[...], _PROJ).astype(cdt)

    q0 = pl.multiple_of(qi * tq, tq)
    x_tile = x_ref[0, pl.ds(q0, tq), :].astype(jnp.float32)     # (tq, D)

    def mha(q_in_f32, Wq, Wo, k_cache, v_cache, valid_len_row, Tk):
        # Head-batched attention.  valid_len_row: (tq, 1) int32 — number of
        # valid kv positions per query row (d2l masked_softmax semantics).
        qb = jnp.broadcast_to(q_in_f32.astype(cdt)[None], (H, tq, D))
        qh = _bdot(qb, Wq[...], _PROJ).astype(cdt)              # (H, tq, hd)
        scores = _bdot(qh, k_cache[...], _QKT) * scale          # (H, tq, Tk) f32
        kv_idx = lax.broadcasted_iota(jnp.int32, (tq, Tk), 1)
        mask = kv_idx < valid_len_row                           # (tq, Tk)
        scores = jnp.where(mask[None], scores, -1e6)
        scores = scores - jnp.max(scores, axis=-1, keepdims=True)
        p = jnp.exp(scores)
        p = p * pl.reciprocal(jnp.sum(p, axis=-1, keepdims=True),
                              approx=approx_recip)
        o = _bdot(p.astype(cdt), v_cache[...], _PROJ)           # (H, tq, hd) f32
        # concat(heads) @ Wo  ==  sum_h o_h @ Wo[h*hd:(h+1)*hd, :]
        oh = _bdot(o.astype(cdt), Wo[...], _PROJ)               # (H, tq, D) f32
        return jnp.sum(oh, axis=0)                              # (tq, D)

    # ---- self-attention: causal, dec_valid_lens = global_q_idx + 1 ----
    q_idx = lax.broadcasted_iota(jnp.int32, (tq, 1), 0) + q0
    X2 = mha(x_tile, wq1, wo1, k1_c, v1_c, q_idx + 1, T)
    Y = _layernorm(X2 + x_tile, g1[...], b1[...])

    # ---- encoder-decoder attention: per-batch enc_valid_lens ----
    ev = enc_valid_ref[b]
    enc_valid = jnp.full((tq, 1), ev, dtype=jnp.int32)
    Y2 = mha(Y, wq2, wo2, k2_c, v2_c, enc_valid, Te)
    Z = _layernorm(Y2 + Y, g2[...], b2[...])

    # ---- position-wise FFN (intermediate is only (tq, F)) ----
    h1 = jnp.maximum(
        jnp.dot(Z.astype(cdt), wf1[...],
                preferred_element_type=jnp.float32) + bf1[...], 0.0)
    Fo = jnp.dot(h1.astype(cdt), wf2[...],
                 preferred_element_type=jnp.float32) + bf2[...]
    out = _layernorm(Fo + Z, g3[...], b3[...])
    out_ref[0] = out.astype(out_ref.dtype)


def decoder_block(x, enc_outputs, enc_valid_lens, params, num_heads,
                  compute_dtype=jnp.bfloat16, tq=None):
    B, T, D = x.shape
    Te = enc_outputs.shape[1]
    H = num_heads
    hd = D // H

    if tq is None:
        tq = T if T <= 128 else 128
    assert T % tq == 0, "T must be divisible by the query tile size"
    n_qt = T // tq

    wdt = jnp.dtype(compute_dtype)

    # Per-head weight layouts prepared once on the host (plain XLA ops):
    #   Wq/Wk/Wv: (D, D) -> (H, D, hd)   (head h = output columns h*hd:(h+1)*hd)
    #   Wo:       (D, D) -> (H, hd, D)   (head h = input rows    h*hd:(h+1)*hd)
    def heads_in(w):
        return w.reshape(D, H, hd).transpose(1, 0, 2).astype(wdt)

    def heads_out(w):
        return w.reshape(H, hd, D).astype(wdt)

    weights = [
        heads_in(params['wq1']), heads_in(params['wk1']),
        heads_in(params['wv1']), heads_out(params['wo1']),
        heads_in(params['wq2']), heads_in(params['wk2']),
        heads_in(params['wv2']), heads_out(params['wo2']),
        params['wf1'].astype(wdt), params['bf1'].astype(jnp.float32),
        params['wf2'].astype(wdt), params['bf2'].astype(jnp.float32),
        params['g1'].astype(jnp.float32), params['b1'].astype(jnp.float32),
        params['g2'].astype(jnp.float32), params['b2'].astype(jnp.float32),
        params['g3'].astype(jnp.float32), params['b3'].astype(jnp.float32),
    ]

    def const_spec(shape):
        # Constant index map: block never changes across the grid, so the DMA
        # is issued once and reused.
        # TODO(synk): at production sizes request single buffering for these
        #             (pipeline_mode=pl.Buffered(1)) to halve weight VMEM.
        return pl.BlockSpec(shape, lambda b, qi, ev, _n=len(shape): (0,) * _n)

    in_specs = [
        # full x per batch element (needed for self-attn K/V); query tile is
        # sliced inside the kernel.
        pl.BlockSpec((1, T, D), lambda b, qi, ev: (b, 0, 0)),
        pl.BlockSpec((1, Te, D), lambda b, qi, ev: (b, 0, 0)),
    ] + [const_spec(tuple(w.shape)) for w in weights]

    grid_spec = pltpu.PrefetchScalarGridSpec(
        num_scalar_prefetch=1,
        grid=(B, n_qt),
        in_specs=in_specs,
        out_specs=pl.BlockSpec((1, tq, D), lambda b, qi, ev: (b, qi, 0)),
        scratch_shapes=[
            pltpu.VMEM((H, T, hd), wdt),    # self-attn K cache
            pltpu.VMEM((H, T, hd), wdt),    # self-attn V cache
            pltpu.VMEM((H, Te, hd), wdt),   # cross-attn K cache
            pltpu.VMEM((H, Te, hd), wdt),   # cross-attn V cache
        ],
    )

    kernel = functools.partial(
        decoder_block_kernel,
        num_heads=H, tq=tq, compute_dtype=wdt,
        approx_recip=(wdt != jnp.dtype(jnp.float32)))

    return pl.pallas_call(
        kernel,
        out_shape=jax.ShapeDtypeStruct((B, T, D), x.dtype),
        grid_spec=grid_spec,
        # batch axis parallel (megacore), query-tile axis sequential so the
        # per-batch K/V caches computed at qi==0 are valid for later tiles.
        # TODO(synk): on v7x set vmem_limit_bytes (<~48MiB) and retune tq.
        compiler_params=pltpu.CompilerParams(
            dimension_semantics=("parallel", "arbitrary")),
    )(enc_valid_lens.astype(jnp.int32), x, enc_outputs, *weights)


# --------------------- pure-JAX reference (for verification) ---------------------
def reference(x, enc, enc_valid, p, num_heads):
    def mha(q_in, kv_in, Wq, Wk, Wv, Wo, valid):   # valid: (B, Tq)
        B, Tq, D = q_in.shape
        hd = D // num_heads
        q, k, v = q_in @ Wq, kv_in @ Wk, kv_in @ Wv
        qh = q.reshape(B, Tq, num_heads, hd).transpose(0, 2, 1, 3)
        kh = k.reshape(B, -1, num_heads, hd).transpose(0, 2, 1, 3)
        vh = v.reshape(B, -1, num_heads, hd).transpose(0, 2, 1, 3)
        scores = jnp.einsum('bhqd,bhkd->bhqk', qh, kh) / math.sqrt(hd)
        kv_idx = jnp.arange(kh.shape[2])
        mask = kv_idx[None, None, None, :] < valid[:, None, :, None]
        attn = jax.nn.softmax(jnp.where(mask, scores, -1e6), axis=-1)
        o = jnp.einsum('bhqk,bhkd->bhqd', attn, vh).transpose(0, 2, 1, 3).reshape(B, Tq, D)
        return o @ Wo

    def ln(x, g, b):
        mu = x.mean(-1, keepdims=True)
        var = ((x - mu) ** 2).mean(-1, keepdims=True)
        return (x - mu) / jnp.sqrt(var + 1e-5) * g + b

    B, T, D = x.shape
    dec_valid = jnp.broadcast_to(jnp.arange(1, T + 1), (B, T))
    X2 = mha(x, x, p['wq1'], p['wk1'], p['wv1'], p['wo1'], dec_valid)
    Y = ln(X2 + x, p['g1'].reshape(-1), p['b1'].reshape(-1))
    enc_valid2 = jnp.broadcast_to(enc_valid[:, None], (B, T))
    Y2 = mha(Y, enc, p['wq2'], p['wk2'], p['wv2'], p['wo2'], enc_valid2)
    Z = ln(Y2 + Y, p['g2'].reshape(-1), p['b2'].reshape(-1))
    Ff = jnp.maximum(Z @ p['wf1'] + p['bf1'].reshape(-1), 0.0) @ p['wf2'] + p['bf2'].reshape(-1)
    return ln(Ff + Z, p['g3'].reshape(-1), p['b3'].reshape(-1))


if __name__ == "__main__":
    # Small, self-consistent shapes:
    B, T, Te = 2, 8, 8
    D = 32                      # key_size = query_size = value_size = num_hiddens
    H = 4                       # num_heads
    F = 64                      # ffn_num_hiddens

    key = jax.random.PRNGKey(0)
    ks = jax.random.split(key, 16)

    def w(k, shape, scale=0.05):
        return (scale * jax.random.normal(k, shape)).astype(jnp.float32)

    params = {
        'wq1': w(ks[0], (D, D)), 'wk1': w(ks[1], (D, D)),
        'wv1': w(ks[2], (D, D)), 'wo1': w(ks[3], (D, D)),
        'wq2': w(ks[4], (D, D)), 'wk2': w(ks[5], (D, D)),
        'wv2': w(ks[6], (D, D)), 'wo2': w(ks[7], (D, D)),
        'wf1': w(ks[8], (D, F)), 'bf1': jnp.zeros((1, F), jnp.float32),
        'wf2': w(ks[9], (F, D)), 'bf2': jnp.zeros((1, D), jnp.float32),
        'g1': jnp.ones((1, D), jnp.float32), 'b1': jnp.zeros((1, D), jnp.float32),
        'g2': jnp.ones((1, D), jnp.float32), 'b2': jnp.zeros((1, D), jnp.float32),
        'g3': jnp.ones((1, D), jnp.float32), 'b3': jnp.zeros((1, D), jnp.float32),
    }

    x = jax.random.normal(ks[10], (B, T, D), dtype=jnp.float32)
    enc_outputs = jax.random.normal(ks[11], (B, Te, D), dtype=jnp.float32)
    enc_valid_lens = jnp.array([5, 8], dtype=jnp.int32)

    ref = reference(x, enc_outputs, enc_valid_lens, params, num_heads=H)

    # Exact-math verification path: f32 matmul operands, exact reciprocal.
    out_f32 = decoder_block(x, enc_outputs, enc_valid_lens, params, num_heads=H,
                            compute_dtype=jnp.float32)
    out_f32 = jax.block_until_ready(out_f32)
    assert out_f32.shape == (B, T, D)
    assert jnp.allclose(out_f32, ref, atol=1e-4, rtol=1e-4), \
        float(jnp.max(jnp.abs(out_f32 - ref)))

    # Fast path: bf16 MXU operands, f32 accumulation, approx softmax reciprocal.
    out_bf16 = decoder_block(x, enc_outputs, enc_valid_lens, params, num_heads=H,
                             compute_dtype=jnp.bfloat16)
    out_bf16 = jax.block_until_ready(out_bf16)
    assert out_bf16.shape == (B, T, D)
    assert jnp.allclose(out_bf16, ref, atol=5e-2, rtol=5e-2), \
        float(jnp.max(jnp.abs(out_bf16 - ref)))

    print("KERNEL_OK")
</pallas_src>

<mosaic_0001>
module attributes {stable_mosaic.version = 11 : i64} {
  func.func @decoder_block_kernel(%arg0: i32, %arg1: i32, %arg2: memref<2xi32, #tpu.memory_space<smem>>, %arg3: memref<1x8x32xf32, #tpu.memory_space<vmem>>, %arg4: memref<1x8x32xf32, #tpu.memory_space<vmem>>, %arg5: memref<4x32x8xf32, #tpu.memory_space<vmem>>, %arg6: memref<4x32x8xf32, #tpu.memory_space<vmem>>, %arg7: memref<4x32x8xf32, #tpu.memory_space<vmem>>, %arg8: memref<4x8x32xf32, #tpu.memory_space<vmem>>, %arg9: memref<4x32x8xf32, #tpu.memory_space<vmem>>, %arg10: memref<4x32x8xf32, #tpu.memory_space<vmem>>, %arg11: memref<4x32x8xf32, #tpu.memory_space<vmem>>, %arg12: memref<4x8x32xf32, #tpu.memory_space<vmem>>, %arg13: memref<32x64xf32, #tpu.memory_space<vmem>>, %arg14: memref<1x64xf32, #tpu.memory_space<vmem>>, %arg15: memref<64x32xf32, #tpu.memory_space<vmem>>, %arg16: memref<1x32xf32, #tpu.memory_space<vmem>>, %arg17: memref<1x32xf32, #tpu.memory_space<vmem>>, %arg18: memref<1x32xf32, #tpu.memory_space<vmem>>, %arg19: memref<1x32xf32, #tpu.memory_space<vmem>>, %arg20: memref<1x32xf32, #tpu.memory_space<vmem>>, %arg21: memref<1x32xf32, #tpu.memory_space<vmem>>, %arg22: memref<1x32xf32, #tpu.memory_space<vmem>>, %arg23: memref<1x8x32xf32, #tpu.memory_space<vmem>>, %arg24: memref<4x8x8xf32, #tpu.memory_space<vmem>>, %arg25: memref<4x8x8xf32, #tpu.memory_space<vmem>>, %arg26: memref<4x8x8xf32, #tpu.memory_space<vmem>>, %arg27: memref<4x8x8xf32, #tpu.memory_space<vmem>>) attributes {dimension_semantics = [#tpu.dimension_semantics<parallel>, #tpu.dimension_semantics<arbitrary>], iteration_bounds = array<i64: 2, 1>, scalar_prefetch = 1 : i64, scratch_operands = 4 : i64, tpu.core_type = #tpu.core_type<tc>, window_params = [{transform_indices = @transform_0, window_bounds = array<i64: 1, 8, 32>}, {transform_indices = @transform_1, window_bounds = array<i64: 1, 8, 32>}, {pipeline_mode = #tpu.pipeline_mode<synchronous>, transform_indices = @transform_2, window_bounds = array<i64: 4, 32, 8>}, {pipeline_mode = #tpu.pipeline_mode<synchronous>, transform_indices = @transform_3, window_bounds = array<i64: 4, 32, 8>}, {pipeline_mode = #tpu.pipeline_mode<synchronous>, transform_indices = @transform_4, window_bounds = array<i64: 4, 32, 8>}, {pipeline_mode = #tpu.pipeline_mode<synchronous>, transform_indices = @transform_5, window_bounds = array<i64: 4, 8, 32>}, {pipeline_mode = #tpu.pipeline_mode<synchronous>, transform_indices = @transform_6, window_bounds = array<i64: 4, 32, 8>}, {pipeline_mode = #tpu.pipeline_mode<synchronous>, transform_indices = @transform_7, window_bounds = array<i64: 4, 32, 8>}, {pipeline_mode = #tpu.pipeline_mode<synchronous>, transform_indices = @transform_8, window_bounds = array<i64: 4, 32, 8>}, {pipeline_mode = #tpu.pipeline_mode<synchronous>, transform_indices = @transform_9, window_bounds = array<i64: 4, 8, 32>}, {pipeline_mode = #tpu.pipeline_mode<synchronous>, transform_indices = @transform_10, window_bounds = array<i64: 32, 64>}, {pipeline_mode = #tpu.pipeline_mode<synchronous>, transform_indices = @transform_11, window_bounds = array<i64: 1, 64>}, {pipeline_mode = #tpu.pipeline_mode<synchronous>, transform_indices = @transform_12, window_bounds = array<i64: 64, 32>}, {pipeline_mode = #tpu.pipeline_mode<synchronous>, transform_indices = @transform_13, window_bounds = array<i64: 1, 32>}, {pipeline_mode = #tpu.pipeline_mode<synchronous>, transform_indices = @transform_14, window_bounds = array<i64: 1, 32>}, {pipeline_mode = #tpu.pipeline_mode<synchronous>, transform_indices = @transform_15, window_bounds = array<i64: 1, 32>}, {pipeline_mode = #tpu.pipeline_mode<synchronous>, transform_indices = @transform_16, window_bounds = array<i64: 1, 32>}, {pipeline_mode = #tpu.pipeline_mode<synchronous>, transform_indices = @transform_17, window_bounds = array<i64: 1, 32>}, {pipeline_mode = #tpu.pipeline_mode<synchronous>, transform_indices = @transform_18, window_bounds = array<i64: 1, 32>}, {pipeline_mode = #tpu.pipeline_mode<synchronous>, transform_indices = @transform_19, window_bounds = array<i64: 1, 32>}, {transform_indices = @transform_20, window_bounds = array<i64: 1, 8, 32>}]} {
    %c0_i32 = arith.constant 0 : i32
    %0 = arith.cmpi eq, %arg1, %c0_i32 : i32
    %1 = arith.extui %0 : i1 to i32
    %c0_i32_0 = arith.constant 0 : i32
    %2 = arith.cmpi ne, %1, %c0_i32_0 : i32
    scf.if %2 {
      %c0_84 = arith.constant 0 : index
      %c0_85 = arith.constant 0 : index
      %c0_86 = arith.constant 0 : index
      %170 = vector.load %arg3[%c0_84, %c0_85, %c0_86] : memref<1x8x32xf32, #tpu.memory_space<vmem>>, vector<1x8x32xf32>
      %171 = vector.shape_cast %170 : vector<1x8x32xf32> to vector<8x32xf32>
      %172 = vector.shape_cast %171 : vector<8x32xf32> to vector<1x8x32xf32>
      %173 = vector.shape_cast %172 : vector<1x8x32xf32> to vector<1x8x32xf32>
      %174 = vector.broadcast %173 : vector<1x8x32xf32> to vector<4x8x32xf32>
      %c0_87 = arith.constant 0 : index
      %c0_88 = arith.constant 0 : index
      %c0_89 = arith.constant 0 : index
      %175 = vector.load %arg6[%c0_87, %c0_88, %c0_89] : memref<4x32x8xf32, #tpu.memory_space<vmem>>, vector<4x32x8xf32>
      %cst_90 = arith.constant dense<0.000000e+00> : vector<4x8x8xf32>
      %176 = tpu.matmul %174, %175, %cst_90 {dimension_numbers = #tpu.dot_dimension_numbers<[2], [1], [1], [2], [0, 0, 0, 1, 1, 2], [0], [0]>} : vector<4x8x32xf32>, vector<4x32x8xf32>, vector<4x8x8xf32> -> vector<4x8x8xf32>
      %c0_91 = arith.constant 0 : index
      %c0_92 = arith.constant 0 : index
      %c0_93 = arith.constant 0 : index
      %177 = vector.load %arg24[%c0_91, %c0_92, %c0_93] : memref<4x8x8xf32, #tpu.memory_space<vmem>>, vector<4x8x8xf32>
      tpu.vector_store %arg24[%c0_91, %c0_92, %c0_93], %176 {strides = array<i32>} : memref<4x8x8xf32, #tpu.memory_space<vmem>>, vector<4x8x8xf32>,
      %c0_94 = arith.constant 0 : index
      %c0_95 = arith.constant 0 : index
      %c0_96 = arith.constant 0 : index
      %178 = vector.load %arg7[%c0_94, %c0_95, %c0_96] : memref<4x32x8xf32, #tpu.memory_space<vmem>>, vector<4x32x8xf32>
      %cst_97 = arith.constant dense<0.000000e+00> : vector<4x8x8xf32>
      %179 = tpu.matmul %174, %178, %cst_97 {dimension_numbers = #tpu.dot_dimension_numbers<[2], [1], [1], [2], [0, 0, 0, 1, 1, 2], [0], [0]>} : vector<4x8x32xf32>, vector<4x32x8xf32>, vector<4x8x8xf32> -> vector<4x8x8xf32>
      %c0_98 = arith.constant 0 : index
      %c0_99 = arith.constant 0 : index
      %c0_100 = arith.constant 0 : index
      %180 = vector.load %arg25[%c0_98, %c0_99, %c0_100] : memref<4x8x8xf32, #tpu.memory_space<vmem>>, vector<4x8x8xf32>
      tpu.vector_store %arg25[%c0_98, %c0_99, %c0_100], %179 {strides = array<i32>} : memref<4x8x8xf32, #tpu.memory_space<vmem>>, vector<4x8x8xf32>,
      %c0_101 = arith.constant 0 : index
      %c0_102 = arith.constant 0 : index
      %c0_103 = arith.constant 0 : index
      %181 = vector.load %arg4[%c0_101, %c0_102, %c0_103] : memref<1x8x32xf32, #tpu.memory_space<vmem>>, vector<1x8x32xf32>
      %182 = vector.shape_cast %181 : vector<1x8x32xf32> to vector<8x32xf32>
      %183 = vector.shape_cast %182 : vector<8x32xf32> to vector<1x8x32xf32>
      %184 = vector.shape_cast %183 : vector<1x8x32xf32> to vector<1x8x32xf32>
      %185 = vector.broadcast %184 : vector<1x8x32xf32> to vector<4x8x32xf32>
      %c0_104 = arith.constant 0 : index
      %c0_105 = arith.constant 0 : index
      %c0_106 = arith.constant 0 : index
      %186 = vector.load %arg10[%c0_104, %c0_105, %c0_106] : memref<4x32x8xf32, #tpu.memory_space<vmem>>, vector<4x32x8xf32>
      %cst_107 = arith.constant dense<0.000000e+00> : vector<4x8x8xf32>
      %187 = tpu.matmul %185, %186, %cst_107 {dimension_numbers = #tpu.dot_dimension_numbers<[2], [1], [1], [2], [0, 0, 0, 1, 1, 2], [0], [0]>} : vector<4x8x32xf32>, vector<4x32x8xf32>, vector<4x8x8xf32> -> vector<4x8x8xf32>
      %c0_108 = arith.constant 0 : index
      %c0_109 = arith.constant 0 : index
      %c0_110 = arith.constant 0 : index
      %188 = vector.load %arg26[%c0_108, %c0_109, %c0_110] : memref<4x8x8xf32, #tpu.memory_space<vmem>>, vector<4x8x8xf32>
      tpu.vector_store %arg26[%c0_108, %c0_109, %c0_110], %187 {strides = array<i32>} : memref<4x8x8xf32, #tpu.memory_space<vmem>>, vector<4x8x8xf32>,
      %c0_111 = arith.constant 0 : index
      %c0_112 = arith.constant 0 : index
      %c0_113 = arith.constant 0 : index
      %189 = vector.load %arg11[%c0_111, %c0_112, %c0_113] : memref<4x32x8xf32, #tpu.memory_space<vmem>>, vector<4x32x8xf32>
      %cst_114 = arith.constant dense<0.000000e+00> : vector<4x8x8xf32>
      %190 = tpu.matmul %185, %189, %cst_114 {dimension_numbers = #tpu.dot_dimension_numbers<[2], [1], [1], [2], [0, 0, 0, 1, 1, 2], [0], [0]>} : vector<4x8x32xf32>, vector<4x32x8xf32>, vector<4x8x8xf32> -> vector<4x8x8xf32>
      %c0_115 = arith.constant 0 : index
      %c0_116 = arith.constant 0 : index
      %c0_117 = arith.constant 0 : index
      %191 = vector.load %arg27[%c0_115, %c0_116, %c0_117] : memref<4x8x8xf32, #tpu.memory_space<vmem>>, vector<4x8x8xf32>
      tpu.vector_store %arg27[%c0_115, %c0_116, %c0_117], %190 {strides = array<i32>} : memref<4x8x8xf32, #tpu.memory_space<vmem>>, vector<4x8x8xf32>,
    } else {
    }
    %c8_i32 = arith.constant 8 : i32
    %3 = arith.muli %arg1, %c8_i32 : i32
    %4 = tpu.assume_multiple %3, 8 : i32
    %c0 = arith.constant 0 : index
    %5 = arith.index_cast %4 : i32 to index
    %c0_1 = arith.constant 0 : index
    %6 = vector.load %arg3[%c0, %5, %c0_1] : memref<1x8x32xf32, #tpu.memory_space<vmem>>, vector<1x8x32xf32>
    %7 = vector.shape_cast %6 : vector<1x8x32xf32> to vector<8x32xf32>
    %8 = tpu.iota {dimensions = array<i32: 0>} : vector<8x1xi32>
    %9 = vector.broadcast %4 : i32 to vector<8x1xi32>
    %10 = arith.addi %8, %9 : vector<8x1xi32>
    %c1_i32 = arith.constant 1 : i32
    %11 = vector.broadcast %c1_i32 : i32 to vector<8x1xi32>
    %12 = arith.addi %10, %11 : vector<8x1xi32>
    %13 = vector.shape_cast %7 : vector<8x32xf32> to vector<1x8x32xf32>
    %14 = vector.shape_cast %13 : vector<1x8x32xf32> to vector<1x8x32xf32>
    %15 = vector.broadcast %14 : vector<1x8x32xf32> to vector<4x8x32xf32>
    %c0_2 = arith.constant 0 : index
    %c0_3 = arith.constant 0 : index
    %c0_4 = arith.constant 0 : index
    %16 = vector.load %arg5[%c0_2, %c0_3, %c0_4] : memref<4x32x8xf32, #tpu.memory_space<vmem>>, vector<4x32x8xf32>
    %cst = arith.constant dense<0.000000e+00> : vector<4x8x8xf32>
    %17 = tpu.matmul %15, %16, %cst {dimension_numbers = #tpu.dot_dimension_numbers<[2], [1], [1], [2], [0, 0, 0, 1, 1, 2], [0], [0]>} : vector<4x8x32xf32>, vector<4x32x8xf32>, vector<4x8x8xf32> -> vector<4x8x8xf32>
    %c0_5 = arith.constant 0 : index
    %c0_6 = arith.constant 0 : index
    %c0_7 = arith.constant 0 : index
    %18 = vector.load %arg24[%c0_5, %c0_6, %c0_7] : memref<4x8x8xf32, #tpu.memory_space<vmem>>, vector<4x8x8xf32>
    %cst_8 = arith.constant dense<0.000000e+00> : vector<4x8x8xf32>
    %19 = tpu.matmul %17, %18, %cst_8 {dimension_numbers = #tpu.dot_dimension_numbers<[2], [2], [1], [1], [0, 0, 0, 1, 1, 1], [0], [0]>} : vector<4x8x8xf32>, vector<4x8x8xf32>, vector<4x8x8xf32> -> vector<4x8x8xf32>
    %cst_9 = arith.constant 0.353553385 : f32
    %20 = vector.broadcast %cst_9 : f32 to vector<4x8x8xf32>
    %21 = arith.mulf %19, %20 : vector<4x8x8xf32>
    %22 = tpu.iota {dimensions = array<i32: 1>} : vector<8x8xi32>
    %23 = vector.broadcast %12 : vector<8x1xi32> to vector<8x8xi32>
    %24 = arith.cmpi slt, %22, %23 : vector<8x8xi32>
    %25 = vector.shape_cast %24 : vector<8x8xi1> to vector<1x8x8xi1>
    %cst_10 = arith.constant -1.000000e+06 : f32
    %26 = vector.shape_cast %25 : vector<1x8x8xi1> to vector<1x8x8xi1>
    %27 = vector.broadcast %26 : vector<1x8x8xi1> to vector<4x8x8xi1>
    %28 = vector.broadcast %cst_10 : f32 to vector<4x8x8xf32>
    %29 = arith.select %27, %21, %28 : vector<4x8x8xi1>, vector<4x8x8xf32>
    %cst_11 = arith.constant dense<0xFF800000> : vector<4x8xf32>
    %30 = vector.multi_reduction <maximumf>, %29, %cst_11 [2] : vector<4x8x8xf32> to vector<4x8xf32>
    %31 = vector.shape_cast %30 : vector<4x8xf32> to vector<4x8x1xf32>
    %32 = vector.broadcast %31 : vector<4x8x1xf32> to vector<4x8x8xf32>
    %33 = arith.subf %29, %32 : vector<4x8x8xf32>
    %34 = math.exp %33 : vector<4x8x8xf32>
    %cst_12 = arith.constant dense<0.000000e+00> : vector<4x8xf32>
    %35 = vector.multi_reduction <add>, %34, %cst_12 [2] : vector<4x8x8xf32> to vector<4x8xf32>
    %36 = vector.shape_cast %35 : vector<4x8xf32> to vector<4x8x1xf32>
    %37 = tpu.reciprocal %36 : vector<4x8x1xf32> -> vector<4x8x1xf32>
    %38 = vector.broadcast %37 : vector<4x8x1xf32> to vector<4x8x8xf32>
    %39 = arith.mulf %34, %38 : vector<4x8x8xf32>
    %c0_13 = arith.constant 0 : index
    %c0_14 = arith.constant 0 : index
    %c0_15 = arith.constant 0 : index
    %40 = vector.load %arg25[%c0_13, %c0_14, %c0_15] : memref<4x8x8xf32, #tpu.memory_space<vmem>>, vector<4x8x8xf32>
    %cst_16 = arith.constant dense<0.000000e+00> : vector<4x8x8xf32>
    %41 = tpu.matmul %39, %40, %cst_16 {dimension_numbers = #tpu.dot_dimension_numbers<[2], [1], [1], [2], [0, 0, 0, 1, 1, 2], [0], [0]>} : vector<4x8x8xf32>, vector<4x8x8xf32>, vector<4x8x8xf32> -> vector<4x8x8xf32>
    %c0_17 = arith.constant 0 : index
    %c0_18 = arith.constant 0 : index
    %c0_19 = arith.constant 0 : index
    %42 = vector.load %arg8[%c0_17, %c0_18, %c0_19] : memref<4x8x32xf32, #tpu.memory_space<vmem>>, vector<4x8x32xf32>
    %cst_20 = arith.constant dense<0.000000e+00> : vector<4x8x32xf32>
    %43 = tpu.matmul %41, %42, %cst_20 {dimension_numbers = #tpu.dot_dimension_numbers<[2], [1], [1], [2], [0, 0, 0, 1, 1, 2], [0], [0]>} : vector<4x8x8xf32>, vector<4x8x32xf32>, vector<4x8x32xf32> -> vector<4x8x32xf32>
    %cst_21 = arith.constant dense<0.000000e+00> : vector<8x32xf32>
    %44 = vector.multi_reduction <add>, %43, %cst_21 [0] : vector<4x8x32xf32> to vector<8x32xf32>
    %45 = arith.addf %44, %7 : vector<8x32xf32>
    %c0_22 = arith.constant 0 : index
    %c0_23 = arith.constant 0 : index
    %46 = vector.load %arg17[%c0_22, %c0_23] : memref<1x32xf32, #tpu.memory_space<vmem>>, vector<1x32xf32>
    %c0_24 = arith.constant 0 : index
    %c0_25 = arith.constant 0 : index
    %47 = vector.load %arg18[%c0_24, %c0_25] : memref<1x32xf32, #tpu.memory_space<vmem>>, vector<1x32xf32>
    %cst_26 = arith.constant dense<0.000000e+00> : vector<8xf32>
    %48 = vector.multi_reduction <add>, %45, %cst_26 [1] : vector<8x32xf32> to vector<8xf32>
    %49 = vector.shape_cast %48 : vector<8xf32> to vector<8x1xf32>
    %cst_27 = arith.constant 3.200000e+01 : f32
    %50 = vector.broadcast %cst_27 : f32 to vector<8x1xf32>
    %51 = arith.divf %49, %50 : vector<8x1xf32>
    %52 = vector.broadcast %51 : vector<8x1xf32> to vector<8x32xf32>
    %53 = arith.subf %45, %52 : vector<8x32xf32>
    %54 = arith.mulf %53, %53 : vector<8x32xf32>
    %cst_28 = arith.constant dense<0.000000e+00> : vector<8xf32>
    %55 = vector.multi_reduction <add>, %54, %cst_28 [1] : vector<8x32xf32> to vector<8xf32>
    %56 = vector.shape_cast %55 : vector<8xf32> to vector<8x1xf32>
    %cst_29 = arith.constant 3.200000e+01 : f32
    %57 = vector.broadcast %cst_29 : f32 to vector<8x1xf32>
    %58 = arith.divf %56, %57 : vector<8x1xf32>
    %59 = vector.broadcast %51 : vector<8x1xf32> to vector<8x32xf32>
    %60 = arith.subf %45, %59 : vector<8x32xf32>
    %cst_30 = arith.constant 9.99999974E-6 : f32
    %61 = vector.broadcast %cst_30 : f32 to vector<8x1xf32>
    %62 = arith.addf %58, %61 : vector<8x1xf32>
    %63 = math.rsqrt %62 : vector<8x1xf32>
    %64 = vector.broadcast %63 : vector<8x1xf32> to vector<8x32xf32>
    %65 = arith.mulf %60, %64 : vector<8x32xf32>
    %66 = vector.broadcast %46 : vector<1x32xf32> to vector<8x32xf32>
    %67 = arith.mulf %65, %66 : vector<8x32xf32>
    %68 = vector.broadcast %47 : vector<1x32xf32> to vector<8x32xf32>
    %69 = arith.addf %67, %68 : vector<8x32xf32>
    %70 = arith.index_cast %arg0 : i32 to index
    %71 = memref.load %arg2[%70] : memref<2xi32, #tpu.memory_space<smem>>
    %72 = vector.broadcast %71 : i32 to vector<8x1xi32>
    %73 = vector.shape_cast %69 : vector<8x32xf32> to vector<1x8x32xf32>
    %74 = vector.shape_cast %73 : vector<1x8x32xf32> to vector<1x8x32xf32>
    %75 = vector.broadcast %74 : vector<1x8x32xf32> to vector<4x8x32xf32>
    %c0_31 = arith.constant 0 : index
    %c0_32 = arith.constant 0 : index
    %c0_33 = arith.constant 0 : index
    %76 = vector.load %arg9[%c0_31, %c0_32, %c0_33] : memref<4x32x8xf32, #tpu.memory_space<vmem>>, vector<4x32x8xf32>
    %cst_34 = arith.constant dense<0.000000e+00> : vector<4x8x8xf32>
    %77 = tpu.matmul %75, %76, %cst_34 {dimension_numbers = #tpu.dot_dimension_numbers<[2], [1], [1], [2], [0, 0, 0, 1, 1, 2], [0], [0]>} : vector<4x8x32xf32>, vector<4x32x8xf32>, vector<4x8x8xf32> -> vector<4x8x8xf32>
    %c0_35 = arith.constant 0 : index
    %c0_36 = arith.constant 0 : index
    %c0_37 = arith.constant 0 : index
    %78 = vector.load %arg26[%c0_35, %c0_36, %c0_37] : memref<4x8x8xf32, #tpu.memory_space<vmem>>, vector<4x8x8xf32>
    %cst_38 = arith.constant dense<0.000000e+00> : vector<4x8x8xf32>
    %79 = tpu.matmul %77, %78, %cst_38 {dimension_numbers = #tpu.dot_dimension_numbers<[2], [2], [1], [1], [0, 0, 0, 1, 1, 1], [0], [0]>} : vector<4x8x8xf32>, vector<4x8x8xf32>, vector<4x8x8xf32> -> vector<4x8x8xf32>
    %cst_39 = arith.constant 0.353553385 : f32
    %80 = vector.broadcast %cst_39 : f32 to vector<4x8x8xf32>
    %81 = arith.mulf %79, %80 : vector<4x8x8xf32>
    %82 = tpu.iota {dimensions = array<i32: 1>} : vector<8x8xi32>
    %83 = vector.broadcast %72 : vector<8x1xi32> to vector<8x8xi32>
    %84 = arith.cmpi slt, %82, %83 : vector<8x8xi32>
    %85 = vector.shape_cast %84 : vector<8x8xi1> to vector<1x8x8xi1>
    %cst_40 = arith.constant -1.000000e+06 : f32
    %86 = vector.shape_cast %85 : vector<1x8x8xi1> to vector<1x8x8xi1>
    %87 = vector.broadcast %86 : vector<1x8x8xi1> to vector<4x8x8xi1>
    %88 = vector.broadcast %cst_40 : f32 to vector<4x8x8xf32>
    %89 = arith.select %87, %81, %88 : vector<4x8x8xi1>, vector<4x8x8xf32>
    %cst_41 = arith.constant dense<0xFF800000> : vector<4x8xf32>
    %90 = vector.multi_reduction <maximumf>, %89, %cst_41 [2] : vector<4x8x8xf32> to vector<4x8xf32>
    %91 = vector.shape_cast %90 : vector<4x8xf32> to vector<4x8x1xf32>
    %92 = vector.broadcast %91 : vector<4x8x1xf32> to vector<4x8x8xf32>
    %93 = arith.subf %89, %92 : vector<4x8x8xf32>
    %94 = math.exp %93 : vector<4x8x8xf32>
    %cst_42 = arith.constant dense<0.000000e+00> : vector<4x8xf32>
    %95 = vector.multi_reduction <add>, %94, %cst_42 [2] : vector<4x8x8xf32> to vector<4x8xf32>
    %96 = vector.shape_cast %95 : vector<4x8xf32> to vector<4x8x1xf32>
    %97 = tpu.reciprocal %96 : vector<4x8x1xf32> -> vector<4x8x1xf32>
    %98 = vector.broadcast %97 : vector<4x8x1xf32> to vector<4x8x8xf32>
    %99 = arith.mulf %94, %98 : vector<4x8x8xf32>
    %c0_43 = arith.constant 0 : index
    %c0_44 = arith.constant 0 : index
    %c0_45 = arith.constant 0 : index
    %100 = vector.load %arg27[%c0_43, %c0_44, %c0_45] : memref<4x8x8xf32, #tpu.memory_space<vmem>>, vector<4x8x8xf32>
    %cst_46 = arith.constant dense<0.000000e+00> : vector<4x8x8xf32>
    %101 = tpu.matmul %99, %100, %cst_46 {dimension_numbers = #tpu.dot_dimension_numbers<[2], [1], [1], [2], [0, 0, 0, 1, 1, 2], [0], [0]>} : vector<4x8x8xf32>, vector<4x8x8xf32>, vector<4x8x8xf32> -> vector<4x8x8xf32>
    %c0_47 = arith.constant 0 : index
    %c0_48 = arith.constant 0 : index
    %c0_49 = arith.constant 0 : index
    %102 = vector.load %arg12[%c0_47, %c0_48, %c0_49] : memref<4x8x32xf32, #tpu.memory_space<vmem>>, vector<4x8x32xf32>
    %cst_50 = arith.constant dense<0.000000e+00> : vector<4x8x32xf32>
    %103 = tpu.matmul %101, %102, %cst_50 {dimension_numbers = #tpu.dot_dimension_numbers<[2], [1], [1], [2], [0, 0, 0, 1, 1, 2], [0], [0]>} : vector<4x8x8xf32>, vector<4x8x32xf32>, vector<4x8x32xf32> -> vector<4x8x32xf32>
    %cst_51 = arith.constant dense<0.000000e+00> : vector<8x32xf32>
    %104 = vector.multi_reduction <add>, %103, %cst_51 [0] : vector<4x8x32xf32> to vector<8x32xf32>
    %105 = arith.addf %104, %69 : vector<8x32xf32>
    %c0_52 = arith.constant 0 : index
    %c0_53 = arith.constant 0 : index
    %106 = vector.load %arg19[%c0_52, %c0_53] : memref<1x32xf32, #tpu.memory_space<vmem>>, vector<1x32xf32>
    %c0_54 = arith.constant 0 : index
    %c0_55 = arith.constant 0 : index
    %107 = vector.load %arg20[%c0_54, %c0_55] : memref<1x32xf32, #tpu.memory_space<vmem>>, vector<1x32xf32>
    %cst_56 = arith.constant dense<0.000000e+00> : vector<8xf32>
    %108 = vector.multi_reduction <add>, %105, %cst_56 [1] : vector<8x32xf32> to vector<8xf32>
    %109 = vector.shape_cast %108 : vector<8xf32> to vector<8x1xf32>
    %cst_57 = arith.constant 3.200000e+01 : f32
    %110 = vector.broadcast %cst_57 : f32 to vector<8x1xf32>
    %111 = arith.divf %109, %110 : vector<8x1xf32>
    %112 = vector.broadcast %111 : vector<8x1xf32> to vector<8x32xf32>
    %113 = arith.subf %105, %112 : vector<8x32xf32>
    %114 = arith.mulf %113, %113 : vector<8x32xf32>
    %cst_58 = arith.constant dense<0.000000e+00> : vector<8xf32>
    %115 = vector.multi_reduction <add>, %114, %cst_58 [1] : vector<8x32xf32> to vector<8xf32>
    %116 = vector.shape_cast %115 : vector<8xf32> to vector<8x1xf32>
    %cst_59 = arith.constant 3.200000e+01 : f32
    %117 = vector.broadcast %cst_59 : f32 to vector<8x1xf32>
    %118 = arith.divf %116, %117 : vector<8x1xf32>
    %119 = vector.broadcast %111 : vector<8x1xf32> to vector<8x32xf32>
    %120 = arith.subf %105, %119 : vector<8x32xf32>
    %cst_60 = arith.constant 9.99999974E-6 : f32
    %121 = vector.broadcast %cst_60 : f32 to vector<8x1xf32>
    %122 = arith.addf %118, %121 : vector<8x1xf32>
    %123 = math.rsqrt %122 : vector<8x1xf32>
    %124 = vector.broadcast %123 : vector<8x1xf32> to vector<8x32xf32>
    %125 = arith.mulf %120, %124 : vector<8x32xf32>
    %126 = vector.broadcast %106 : vector<1x32xf32> to vector<8x32xf32>
    %127 = arith.mulf %125, %126 : vector<8x32xf32>
    %128 = vector.broadcast %107 : vector<1x32xf32> to vector<8x32xf32>
    %129 = arith.addf %127, %128 : vector<8x32xf32>
    %c0_61 = arith.constant 0 : index
    %c0_62 = arith.constant 0 : index
    %130 = vector.load %arg13[%c0_61, %c0_62] : memref<32x64xf32, #tpu.memory_space<vmem>>, vector<32x64xf32>
    %cst_63 = arith.constant dense<0.000000e+00> : vector<8x64xf32>
    %131 = tpu.matmul %129, %130, %cst_63 {dimension_numbers = #tpu.dot_dimension_numbers<[1], [0], [0], [1], [0, 0, 1, 1], [], []>} : vector<8x32xf32>, vector<32x64xf32>, vector<8x64xf32> -> vector<8x64xf32>
    %c0_64 = arith.constant 0 : index
    %c0_65 = arith.constant 0 : index
    %132 = vector.load %arg14[%c0_64, %c0_65] : memref<1x64xf32, #tpu.memory_space<vmem>>, vector<1x64xf32>
    %133 = vector.broadcast %132 : vector<1x64xf32> to vector<8x64xf32>
    %134 = arith.addf %131, %133 : vector<8x64xf32>
    %cst_66 = arith.constant 0.000000e+00 : f32
    %135 = vector.broadcast %cst_66 : f32 to vector<8x64xf32>
    %136 = arith.maximumf %134, %135 : vector<8x64xf32>
    %c0_67 = arith.constant 0 : index
    %c0_68 = arith.constant 0 : index
    %137 = vector.load %arg15[%c0_67, %c0_68] : memref<64x32xf32, #tpu.memory_space<vmem>>, vector<64x32xf32>
    %cst_69 = arith.constant dense<0.000000e+00> : vector<8x32xf32>
    %138 = tpu.matmul %136, %137, %cst_69 {dimension_numbers = #tpu.dot_dimension_numbers<[1], [0], [0], [1], [0, 0, 1, 1], [], []>} : vector<8x64xf32>, vector<64x32xf32>, vector<8x32xf32> -> vector<8x32xf32>
    %c0_70 = arith.constant 0 : index
    %c0_71 = arith.constant 0 : index
    %139 = vector.load %arg16[%c0_70, %c0_71] : memref<1x32xf32, #tpu.memory_space<vmem>>, vector<1x32xf32>
    %140 = vector.broadcast %139 : vector<1x32xf32> to vector<8x32xf32>
    %141 = arith.addf %138, %140 : vector<8x32xf32>
    %142 = arith.addf %141, %129 : vector<8x32xf32>
    %c0_72 = arith.constant 0 : index
    %c0_73 = arith.constant 0 : index
    %143 = vector.load %arg21[%c0_72, %c0_73] : memref<1x32xf32, #tpu.memory_space<vmem>>, vector<1x32xf32>
    %c0_74 = arith.constant 0 : index
    %c0_75 = arith.constant 0 : index
    %144 = vector.load %arg22[%c0_74, %c0_75] : memref<1x32xf32, #tpu.memory_space<vmem>>, vector<1x32xf32>
    %cst_76 = arith.constant dense<0.000000e+00> : vector<8xf32>
    %145 = vector.multi_reduction <add>, %142, %cst_76 [1] : vector<8x32xf32> to vector<8xf32>
    %146 = vector.shape_cast %145 : vector<8xf32> to vector<8x1xf32>
    %cst_77 = arith.constant 3.200000e+01 : f32
    %147 = vector.broadcast %cst_77 : f32 to vector<8x1xf32>
    %148 = arith.divf %146, %147 : vector<8x1xf32>
    %149 = vector.broadcast %148 : vector<8x1xf32> to vector<8x32xf32>
    %150 = arith.subf %142, %149 : vector<8x32xf32>
    %151 = arith.mulf %150, %150 : vector<8x32xf32>
    %cst_78 = arith.constant dense<0.000000e+00> : vector<8xf32>
    %152 = vector.multi_reduction <add>, %151, %cst_78 [1] : vector<8x32xf32> to vector<8xf32>
    %153 = vector.shape_cast %152 : vector<8xf32> to vector<8x1xf32>
    %cst_79 = arith.constant 3.200000e+01 : f32
    %154 = vector.broadcast %cst_79 : f32 to vector<8x1xf32>
    %155 = arith.divf %153, %154 : vector<8x1xf32>
    %156 = vector.broadcast %148 : vector<8x1xf32> to vector<8x32xf32>
    %157 = arith.subf %142, %156 : vector<8x32xf32>
    %cst_80 = arith.constant 9.99999974E-6 : f32
    %158 = vector.broadcast %cst_80 : f32 to vector<8x1xf32>
    %159 = arith.addf %155, %158 : vector<8x1xf32>
    %160 = math.rsqrt %159 : vector<8x1xf32>
    %161 = vector.broadcast %160 : vector<8x1xf32> to vector<8x32xf32>
    %162 = arith.mulf %157, %161 : vector<8x32xf32>
    %163 = vector.broadcast %143 : vector<1x32xf32> to vector<8x32xf32>
    %164 = arith.mulf %162, %163 : vector<8x32xf32>
    %165 = vector.broadcast %144 : vector<1x32xf32> to vector<8x32xf32>
    %166 = arith.addf %164, %165 : vector<8x32xf32>
    %c0_81 = arith.constant 0 : index
    %c0_82 = arith.constant 0 : index
    %c0_83 = arith.constant 0 : index
    %167 = vector.load %arg23[%c0_81, %c0_82, %c0_83] : memref<1x8x32xf32, #tpu.memory_space<vmem>>, vector<1x8x32xf32>
    %168 = vector.shape_cast %167 : vector<1x8x32xf32> to vector<8x32xf32>
    %169 = vector.shape_cast %166 : vector<8x32xf32> to vector<1x8x32xf32>
    tpu.vector_store %arg23[%c0_81, %c0_82, %c0_83], %169 {strides = array<i32>} : memref<1x8x32xf32, #tpu.memory_space<vmem>>, vector<1x8x32xf32>,
    return
  }
  func.func @transform_0(%arg0: i32, %arg1: i32, %arg2: memref<2xi32, #tpu.memory_space<smem>>) -> (i32, i32, i32) {
    %c0_i32 = arith.constant 0 : i32
    %c0_i32_0 = arith.constant 0 : i32
    %c0_i32_1 = arith.constant 0 : i32
    return %arg0, %c0_i32, %c0_i32_0 : i32, i32, i32
  }
  func.func @transform_1(%arg0: i32, %arg1: i32, %arg2: memref<2xi32, #tpu.memory_space<smem>>) -> (i32, i32, i32) {
    %c0_i32 = arith.constant 0 : i32
    %c0_i32_0 = arith.constant 0 : i32
    %c0_i32_1 = arith.constant 0 : i32
    return %arg0, %c0_i32, %c0_i32_0 : i32, i32, i32
  }
  func.func @transform_2(%arg0: i32, %arg1: i32, %arg2: memref<2xi32, #tpu.memory_space<smem>>) -> (i32, i32, i32) {
    %c0_i32 = arith.constant 0 : i32
    %c0_i32_0 = arith.constant 0 : i32
    %c0_i32_1 = arith.constant 0 : i32
    %c0_i32_2 = arith.constant 0 : i32
    return %c0_i32, %c0_i32_0, %c0_i32_1 : i32, i32, i32
  }
  func.func @transform_3(%arg0: i32, %arg1: i32, %arg2: memref<2xi32, #tpu.memory_space<smem>>) -> (i32, i32, i32) {
    %c0_i32 = arith.constant 0 : i32
    %c0_i32_0 = arith.constant 0 : i32
    %c0_i32_1 = arith.constant 0 : i32
    %c0_i32_2 = arith.constant 0 : i32
    return %c0_i32, %c0_i32_0, %c0_i32_1 : i32, i32, i32
  }
  func.func @transform_4(%arg0: i32, %arg1: i32, %arg2: memref<2xi32, #tpu.memory_space<smem>>) -> (i32, i32, i32) {
    %c0_i32 = arith.constant 0 : i32
    %c0_i32_0 = arith.constant 0 : i32
    %c0_i32_1 = arith.constant 0 : i32
    %c0_i32_2 = arith.constant 0 : i32
    return %c0_i32, %c0_i32_0, %c0_i32_1 : i32, i32, i32
  }
  func.func @transform_5(%arg0: i32, %arg1: i32, %arg2: memref<2xi32, #tpu.memory_space<smem>>) -> (i32, i32, i32) {
    %c0_i32 = arith.constant 0 : i32
    %c0_i32_0 = arith.constant 0 : i32
    %c0_i32_1 = arith.constant 0 : i32
    %c0_i32_2 = arith.constant 0 : i32
    return %c0_i32, %c0_i32_0, %c0_i32_1 : i32, i32, i32
  }
  func.func @transform_6(%arg0: i32, %arg1: i32, %arg2: memref<2xi32, #tpu.memory_space<smem>>) -> (i32, i32, i32) {
    %c0_i32 = arith.constant 0 : i32
    %c0_i32_0 = arith.constant 0 : i32
    %c0_i32_1 = arith.constant 0 : i32
    %c0_i32_2 = arith.constant 0 : i32
    return %c0_i32, %c0_i32_0, %c0_i32_1 : i32, i32, i32
  }
  func.func @transform_7(%arg0: i32, %arg1: i32, %arg2: memref<2xi32, #tpu.memory_space<smem>>) -> (i32, i32, i32) {
    %c0_i32 = arith.constant 0 : i32
    %c0_i32_0 = arith.constant 0 : i32
    %c0_i32_1 = arith.constant 0 : i32
    %c0_i32_2 = arith.constant 0 : i32
    return %c0_i32, %c0_i32_0, %c0_i32_1 : i32, i32, i32
  }
  func.func @transform_8(%arg0: i32, %arg1: i32, %arg2: memref<2xi32, #tpu.memory_space<smem>>) -> (i32, i32, i32) {
    %c0_i32 = arith.constant 0 : i32
    %c0_i32_0 = arith.constant 0 : i32
    %c0_i32_1 = arith.constant 0 : i32
    %c0_i32_2 = arith.constant 0 : i32
    return %c0_i32, %c0_i32_0, %c0_i32_1 : i32, i32, i32
  }
  func.func @transform_9(%arg0: i32, %arg1: i32, %arg2: memref<2xi32, #tpu.memory_space<smem>>) -> (i32, i32, i32) {
    %c0_i32 = arith.constant 0 : i32
    %c0_i32_0 = arith.constant 0 : i32
    %c0_i32_1 = arith.constant 0 : i32
    %c0_i32_2 = arith.constant 0 : i32
    return %c0_i32, %c0_i32_0, %c0_i32_1 : i32, i32, i32
  }
  func.func @transform_10(%arg0: i32, %arg1: i32, %arg2: memref<2xi32, #tpu.memory_space<smem>>) -> (i32, i32) {
    %c0_i32 = arith.constant 0 : i32
    %c0_i32_0 = arith.constant 0 : i32
    %c0_i32_1 = arith.constant 0 : i32
    return %c0_i32, %c0_i32_0 : i32, i32
  }
  func.func @transform_11(%arg0: i32, %arg1: i32, %arg2: memref<2xi32, #tpu.memory_space<smem>>) -> (i32, i32) {
    %c0_i32 = arith.constant 0 : i32
    %c0_i32_0 = arith.constant 0 : i32
    %c0_i32_1 = arith.constant 0 : i32
    return %c0_i32, %c0_i32_0 : i32, i32
  }
  func.func @transform_12(%arg0: i32, %arg1: i32, %arg2: memref<2xi32, #tpu.memory_space<smem>>) -> (i32, i32) {
    %c0_i32 = arith.constant 0 : i32
    %c0_i32_0 = arith.constant 0 : i32
    %c0_i32_1 = arith.constant 0 : i32
    return %c0_i32, %c0_i32_0 : i32, i32
  }
  func.func @transform_13(%arg0: i32, %arg1: i32, %arg2: memref<2xi32, #tpu.memory_space<smem>>) -> (i32, i32) {
    %c0_i32 = arith.constant 0 : i32
    %c0_i32_0 = arith.constant 0 : i32
    %c0_i32_1 = arith.constant 0 : i32
    return %c0_i32, %c0_i32_0 : i32, i32
  }
  func.func @transform_14(%arg0: i32, %arg1: i32, %arg2: memref<2xi32, #tpu.memory_space<smem>>) -> (i32, i32) {
    %c0_i32 = arith.constant 0 : i32
    %c0_i32_0 = arith.constant 0 : i32
    %c0_i32_1 = arith.constant 0 : i32
    return %c0_i32, %c0_i32_0 : i32, i32
  }
  func.func @transform_15(%arg0: i32, %arg1: i32, %arg2: memref<2xi32, #tpu.memory_space<smem>>) -> (i32, i32) {
    %c0_i32 = arith.constant 0 : i32
    %c0_i32_0 = arith.constant 0 : i32
    %c0_i32_1 = arith.constant 0 : i32
    return %c0_i32, %c0_i32_0 : i32, i32
  }
  func.func @transform_16(%arg0: i32, %arg1: i32, %arg2: memref<2xi32, #tpu.memory_space<smem>>) -> (i32, i32) {
    %c0_i32 = arith.constant 0 : i32
    %c0_i32_0 = arith.constant 0 : i32
    %c0_i32_1 = arith.constant 0 : i32
    return %c0_i32, %c0_i32_0 : i32, i32
  }
  func.func @transform_17(%arg0: i32, %arg1: i32, %arg2: memref<2xi32, #tpu.memory_space<smem>>) -> (i32, i32) {
    %c0_i32 = arith.constant 0 : i32
    %c0_i32_0 = arith.constant 0 : i32
    %c0_i32_1 = arith.constant 0 : i32
    return %c0_i32, %c0_i32_0 : i32, i32
  }
  func.func @transform_18(%arg0: i32, %arg1: i32, %arg2: memref<2xi32, #tpu.memory_space<smem>>) -> (i32, i32) {
    %c0_i32 = arith.constant 0 : i32
    %c0_i32_0 = arith.constant 0 : i32
    %c0_i32_1 = arith.constant 0 : i32
    return %c0_i32, %c0_i32_0 : i32, i32
  }
  func.func @transform_19(%arg0: i32, %arg1: i32, %arg2: memref<2xi32, #tpu.memory_space<smem>>) -> (i32, i32) {
    %c0_i32 = arith.constant 0 : i32
    %c0_i32_0 = arith.constant 0 : i32
    %c0_i32_1 = arith.constant 0 : i32
    return %c0_i32, %c0_i32_0 : i32, i32
  }
  func.func @transform_20(%arg0: i32, %arg1: i32, %arg2: memref<2xi32, #tpu.memory_space<smem>>) -> (i32, i32, i32) {
    %c0_i32 = arith.constant 0 : i32
    %c0_i32_0 = arith.constant 0 : i32
    return %arg0, %arg1, %c0_i32 : i32, i32, i32
  }
}

</mosaic_0001>

<bundles_post_ra>
// kernel: tpu_custom_call.1
= control target key start
LH: loop header
LB: loop body
LE: loop exit
PB: predicated region body
PF: predicated region fallthrough
CT: control target
= control target key end

     0   :  { %s6754_s0 = inlined_call_operand.vmem [shape: s32[2], index: 0, kind: input, shape index: {}]   ;;  %s6755_s1 = inlined_call_operand.vmem [shape: f32[2,8,32], index: 1, kind: input, shape index: {}]   ;;  %s6756_s2 = inlined_call_operand.vmem [shape: f32[2,8,32], index: 2, kind: input, shape index: {}]   ;;  %s6757_s3 = inlined_call_operand.vmem [shape: f32[4,32,8], index: 3, kind: input, shape index: {}]   ;;  %s6758_s4 = inlined_call_operand.vmem [shape: f32[4,32,8], index: 4, kind: input, shape index: {}]   ;;  %s6759_s5 = inlined_call_operand.vmem [shape: f32[4,32,8], index: 5, kind: input, shape index: {}]   ;;  %s6760_s6 = inlined_call_operand.vmem [shape: f32[4,8,32], index: 6, kind: input, shape index: {}]   ;;  %s6761_s7 = inlined_call_operand.vmem [shape: f32[4,32,8], index: 7, kind: input, shape index: {}]   ;;  %s6762_s8 = inlined_call_operand.vmem [shape: f32[4,32,8], index: 8, kind: input, shape index: {}]   ;;  %s6763_s9 = inlined_call_operand.vmem [shape: f32[4,32,8], index: 9, kind: input, shape index: {}]   ;;  %s6764_s10 = inlined_call_operand.vmem [shape: f32[4,8,32], index: 10, kind: input, shape index: {}]   ;;  %s6765_s11 = inlined_call_operand.vmem [shape: f32[32,64], index: 11, kind: input, shape index: {}]   ;;  %s6766_s12 = inlined_call_operand.vmem [shape: f32[1,64], index: 12, kind: input, shape index: {}]   ;;  %s6767_s13 = inlined_call_operand.vmem [shape: f32[64,32], index: 13, kind: input, shape index: {}]   ;;  %s6768_s14 = inlined_call_operand.vmem [shape: f32[1,32], index: 14, kind: input, shape index: {}]   ;;  %s6769_s15 = inlined_call_operand.vmem [shape: f32[1,32], index: 15, kind: input, shape index: {}]   ;;  %s6770_s16 = inlined_call_operand.vmem [shape: f32[1,32], index: 16, kind: input, shape index: {}]   ;;  %s6771_s17 = inlined_call_operand.vmem [shape: f32[1,32], index: 17, kind: input, shape index: {}]   ;;  %s6772_s18 = inlined_call_operand.vmem [shape: f32[1,32], index: 18, kind: input, shape index: {}]   ;;  %s6773_s19 = inlined_call_operand.vmem [shape: f32[1,32], index: 19, kind: input, shape index: {}]   ;;  %s6774_s20 = inlined_call_operand.vmem [shape: f32[1,32], index: 20, kind: input, shape index: {}]   ;;  %s6775_s21 = inlined_call_operand.hbm [shape: f32[2,8,32], index: 21, kind: output, shape index: {}]  }
   0x1   :  { %6786 = sst [smem:[#allocation18_spill]] %s6754_s0 }
   0x2   :  { %6787 = sst [smem:[#allocation19_spill]] %s6755_s1  ;;  %s6796_s26 = sld [smem:[#allocation18_spill]] }
   0x3   :  { %6788 = sst [smem:[#allocation20_spill]] %s6756_s2 }
   0x4   :  { %6789 = sst [smem:[#allocation21_spill]] %s6757_s3 }
   0x5   :  { %6790 = sst [smem:[#allocation22_spill]] %s6758_s4 }
   0x6   :  { %6791 = sst [smem:[#allocation23_spill]] %s6759_s5 }
   0x7   :  { %6792 = sst [smem:[#allocation24_spill]] %s6760_s6 }
   0x8   :  { %6793 = sst [smem:[#allocation25_spill]] %s6761_s7 }
   0x9   :  { %6794 = sst [smem:[#allocation26_spill]] %s6768_s14  ;;  %s26_s14 = sshll.u32 %s6796_s26, 4  ;;  %s27_s14 = int_to_ptr.vmem [resolvable:$true] %s26_s14 }
   0xa   :  { %6795 = sst [smem:[#allocation27_spill]] %s6775_s21  ;;  %s5709_s27 = scalar_lea.vmem %s27_s14, 16 }
   0xb   :  { %p5710_p0 = scmp.ne.s32.totalorder %s27_s14, %s5709_s27  ;;  %p5714_p1 = scmp.lt.s32.totalorder %s27_s14, %s27_s14 }
   0xc   :  { %p5715_p2 = scmp.lt.s32.totalorder %s5709_s27, %s5709_s27 }
   0xe   :  { %p5716_p3 = por %p5715_p2, %p5714_p1 }
  0x10   :  { %p5717_p4 = pnand %p5716_p3, %p5710_p0 }
  0x12   :  { %5720 = shalt.err (!%p5717_p4)  }
  0x13   :  { %s5803_s3 = smov [#allocation7]  }
  0x14   :  { %29 = dma.vmem_to_smem %s27_s14, 16, %s5803_s3, [#allocation6] }
  0x15   :  { %5773 = dma.done.wait [#allocation6], 16 }
  0x16   :  { %5774 = vsyncadd [#allocation6], 4294967280 }
  0x17   :  { %31 = sfence }
  0x18   :  { %32 = vsyncpa [#allocation9], 0 }
  0x19   :  { %34 = vsyncpa [#allocation9 + $0x1], 0  ;;  %s5921_s28 = smov 0   ;;  %s5923_s29 = smov 0  }
  0x1a   :  { %s5925_s0 = smov 0   ;;  %s5927_s4 = smov 0  }
  0x1b   :  { %s5929_s30 = smov 0   ;;  %s5931_s5 = smov 0  }
  0x1c LB: > { %6797 = sst [smem:[#allocation12_spill]] %s5781_s28  ;;  %s4776_s14 = sadd.s32 4294967295, %s5801_s5   ;;  %s5801_s5 = sphi %s5931_s5, %s40_s5   ;;  %s5797_s30 = sphi %s5929_s30, %s6824_s30   ;;  %s5793_s4 = sphi %s5927_s4, %s6820_s4   ;;  %s5789_s0 = sphi %s5925_s0, %s6819_s0   ;;  %s5785_s29 = sphi %s5923_s29, %s6823_s29   ;;  %s5781_s28 = sphi %s5921_s28, %s6822_s28  }
  0x1d   : > { %6798 = sst [smem:[#allocation13_spill]] %s5789_s0  ;;  %s4777_s22 = sadd.s32 4294967294, %s5801_s5  }
  0x1e   : > { %6799 = sst [smem:[#allocation14_spill]] %s5797_s30  ;;  %s52_s23 = sadd.s32 1, %s5797_s30 }
  0x1f   : > { %s491_s1 = sadd.s32 1, %s5789_s0  ;;  %p54_p5 = scmp.ge.s32.totalorder %s52_s23, 2 }
  0x20   : > { %p501_p6 = scmp.ne.s32.totalorder %s5789_s0, %s5785_s29  ;;  %p502_p7 = scmp.eq.s32.totalorder %s4776_s14, 1 }
  0x21   : > { %p507_p8 = scmp.ne.s32.totalorder %s5785_s29, %s5781_s28  ;;  %s6826_s23 = smov (%p54_p5, %s52_s23), 0 }
  0x22   : > { %6800 = sst [smem:[#allocation15_spill]] %s6826_s23  ;;  %p5961_p9 = por %p502_p7, %p501_p6 }
  0x23   : > { %p508_p10 = scmp.eq.s32.totalorder %s4777_s22, 1  ;;  %s486_s2 = ssub.s32 %s5797_s30, %s6826_s23 }
  0x24   : > { %p4780_p11 = scmp.ge.s32.totalorder %s5801_s5, 1  ;;  %p489_p12 = scmp.eq.s32.totalorder %s486_s2, 0 }
  0x25   : > { %p5968_p13 = por %p508_p10, %p507_p8  ;;  %p594_p0 = scmp.lt.s32.totalorder %s5801_s5, 3 }
  0x26   : > { %s5974_s26 = scalar_select %p489_p12, %s5789_s0, %s491_s1  }
  0x27   : > { %s6802_s25 = scalar_select %p5968_p13, 1, 0 }
  0x28   : > { %6804 = sst [smem:[#allocation17_spill]] %s5974_s26  ;;  %p595_p1 = pnand %p4780_p11, %p594_p0 }
  0x29   : > { %6803 = sst [smem:[#allocation16_spill]] %s6802_s25  ;;  %s6805_s14 = sld [smem:[#allocation22_spill]] (!%p595_p1)  ;;  %v5804_v3 = vmov (!%p595_p1), 0.0|0.0   ;;  %vm5805_vm0 = vmmov (!%p595_p1), 0   ;;  %v5806_v11 = vmov (!%p595_p1), 0.0   ;;  %vm684_vm1 = vcmask (!%p595_p1), 261120  }
  0x2a   : > { %598 = sbr.rel (%p595_p1) target bundleno = 3869 (0xf1d), region = 100  ;;  %5450 = vmatprep.subr.bf16.mxu0 (!%p595_p1), %v5804_v3  ;;  %5456 = vmatprep.subr.bf16.mxu1 (!%p595_p1), %v5804_v3  ;;  %p655_p2 = scmp.lt.s32.totalorder (!%p595_p1), %s5793_s4, 1  ;;  %v1274_v51 = vld [vmem:[%s6762_s8] sm:$0xff] (!%p595_p1)  ;;  %v1275_v52 = vld [vmem:[%s6762_s8 + $0x8] sm:$0xff] (!%p595_p1)  ;;  %v1276_v57 = vld [vmem:[%s6762_s8 + $0x10] sm:$0xff] (!%p595_p1)  ;;  %vm968_vm2 = vcmask (!%p595_p1), 64512  }
  0x2b   : > { %5044 = vmatprep.mubr.msk.f32.mxu0 (!%p595_p1), %vm5805_vm0, %v5806_v11  ;;  %5055 = vmatprep.mubr.msk.f32.mxu1 (!%p595_p1), %vm5805_vm0, %v5806_v11  ;;  %s6806_s30 = sld [smem:[#allocation19_spill]] (!%p595_p1)  ;;  %s6807_s1 = sld [smem:[#allocation23_spill]] (!%p595_p1)  ;;  %v1278_v53 = vld [vmem:[%s6762_s8 + $0x20] sm:$0xff] (!%p595_p1)  ;;  %v1279_v54 = vld [vmem:[%s6762_s8 + $0x28] sm:$0xff] (!%p595_p1)  ;;  %v5499_v55 = vpack.c.bf16 (!%p595_p1), %v1275_v52, %v1274_v51  ;;  %v1277_v58 = vld [vmem:[%s6762_s8 + $0x18] sm:$0xff] (!%p595_p1)  ;;  %vm4574_vm5 = vcmask (!%p595_p1), 523264  }
  0x2c   : > { %v5505_v56 = vpack.c.bf16 (!%p595_p1), %v1279_v54, %v1278_v53  ;;  %v1280_v59 = vld [vmem:[%s6762_s8 + $0x30] sm:$0xff] (!%p595_p1)  ;;  %v1281_v60 = vld [vmem:[%s6762_s8 + $0x38] sm:$0xff] (!%p595_p1)  ;;  %v5502_v61 = vpack.c.bf16 (!%p595_p1), %v1277_v58, %v1276_v57  ;;  %s6808_s0 = sld [smem:[#allocation20_spill]] (!%p595_p1)  ;;  %v1282_v63 = vld [vmem:[%s6762_s8 + $0x40] sm:$0xff] (!%p595_p1)  ;;  %s6810_s6 = sld [smem:[#allocation24_spill]] (!%p595_p1) }
  0x2d   : > { %v5508_v62 = vpack.c.bf16 (!%p595_p1), %v1281_v60, %v1280_v59  ;;  %s6811_s7 = sld [smem:[#allocation25_spill]] (!%p595_p1)  ;;  %s652_s28 = sand.u32 (!%p595_p1), 1, %s5785_s29  }
  0x2f   : > { %v668_v0 = vld [vmem:[%s6805_s14] sm:$0xff] (!%p595_p1)  ;;  %v669_v1 = vld [vmem:[%s6805_s14 + $0x8] sm:$0xff] (!%p595_p1)  ;;  %v670_v6 = vld [vmem:[%s6805_s14 + $0x10] sm:$0xff] (!%p595_p1) }
  0x30   : > { %v672_v2 = vld [vmem:[%s6805_s14 + $0x20] sm:$0xff] (!%p595_p1)  ;;  %v5451_v4 = vpack.c.bf16 (!%p595_p1), %v669_v1, %v668_v0  ;;  %v673_v5 = vld [vmem:[%s6805_s14 + $0x28] sm:$0xff] (!%p595_p1)  ;;  %v671_v7 = vld [vmem:[%s6805_s14 + $0x18] sm:$0xff] (!%p595_p1) }
  0x31   : > { %v5457_v8 = vpack.c.bf16 %v673_v5, %v672_v2  ;;  %v674_v9 = vld [vmem:[%s6805_s14 + $0x30] sm:$0xff]  ;;  %v675_v10 = vld [vmem:[%s6805_s14 + $0x38] sm:$0xff]  ;;  %v5454_v12 = vpack.c.bf16 %v671_v7, %v670_v6  ;;  %s6008_s23 = scalar_select %p655_p2, %s5793_s4, 1  ;;  %v676_v14 = vld [vmem:[%s6805_s14 + $0x40] sm:$0xff] }
  0x32   : > { %5452 = vmatpush3.bf16.msra.mxu0 %v5451_v4  ;;  %v5460_v13 = vpack.c.bf16 %v675_v10, %v674_v9  ;;  %v677_v15 = vld [vmem:[%s6805_s14 + $0x48] sm:$0xff]  ;;  %v680_v16 = vld [vmem:[%s6805_s14 + $0x60] sm:$0xff]  ;;  %v678_v21 = vld [vmem:[%s6805_s14 + $0x50] sm:$0xff] }
  0x33   : > { %5458 = vmatpush3.bf16.msra.mxu1 %v5457_v8  ;;  %5453 = vmatprep.subr.bf16.mxu0 %v5804_v3  ;;  %s4782_s3 = sshll.u32 %s6008_s23, 3  ;;  %v681_v17 = vld [vmem:[%s6805_s14 + $0x68] sm:$0xff]  ;;  %v5463_v19 = vpack.c.bf16 %v677_v15, %v676_v14  ;;  %v679_v22 = vld [vmem:[%s6805_s14 + $0x58] sm:$0xff]  ;;  %v682_v23 = vld [vmem:[%s6805_s14 + $0x70] sm:$0xff] }
  0x34   : > { %5459 = vmatprep.subr.bf16.mxu1 %v5804_v3  ;;  %s658_s26 = scalar_lea.vmem %s6806_s30, %s4782_s3  ;;  %v5469_v20 = vpack.c.bf16 %v681_v17, %v680_v16  ;;  %v683_v24 = vld [vmem:[%s6805_s14 + $0x78] sm:$0xff]  ;;  %v5466_v25 = vpack.c.bf16 %v679_v22, %v678_v21  ;;  %v973_v27 = vld [vmem:[%s6807_s1] sm:$0xff]  ;;  %v974_v28 = vld [vmem:[%s6807_s1 + $0x8] sm:$0xff]  ;;  %s662_s25 = scalar_lea.vmem %s6808_s0, %s4782_s3 }
  0x35   : > { %v6030_v18 = vld [vmem:[%s658_s26] sm:$0xff]  ;;  %v5472_v26 = vpack.c.bf16 %v683_v24, %v682_v23  ;;  %v978_v30 = vld [vmem:[%s6807_s1 + $0x28] sm:$0xff]  ;;  %v5475_v31 = vpack.c.bf16 %v974_v28, %v973_v27  ;;  %v975_v33 = vld [vmem:[%s6807_s1 + $0x10] sm:$0xff]  ;;  %s3181_s0 = sld [smem:[#allocation7 + %s5793_s4]]  ;;  %s4851_s26 = sshll.u32 %s5793_s4, 7 }
  0x36   : > { %5455 = vmatpush3.bf16.msra.mxu0 %v5454_v12  ;;  %v977_v29 = vld [vmem:[%s6807_s1 + $0x20] sm:$0xff]  ;;  %v976_v34 = vld [vmem:[%s6807_s1 + $0x18] sm:$0xff]  ;;  %v979_v35 = vld [vmem:[%s6807_s1 + $0x30] sm:$0xff]  ;;  %s6814_s3 = sld [smem:[#allocation26_spill]]  ;;  %s5807_s4 = smov [#allocation8]  }
  0x37   : > { %5461 = vmatpush3.bf16.msra.mxu1 %v5460_v13  ;;  %5462 = vmatprep.subr.bf16.mxu0 %v5804_v3  ;;  %v5481_v32 = vpack.c.bf16 %v978_v30, %v977_v29  ;;  %v980_v36 = vld [vmem:[%s6807_s1 + $0x38] sm:$0xff]  ;;  %v5478_v37 = vpack.c.bf16 %v976_v34, %v975_v33  ;;  %v981_v39 = vld [vmem:[%s6807_s1 + $0x40] sm:$0xff]  ;;  %v982_v40 = vld [vmem:[%s6807_s1 + $0x48] sm:$0xff] }
  0x38   : > { %5468 = vmatprep.subr.bf16.mxu1 %v5804_v3  ;;  %v5484_v38 = vpack.c.bf16 %v980_v36, %v979_v35  ;;  %v985_v41 = vld [vmem:[%s6807_s1 + $0x60] sm:$0xff]  ;;  %v986_v42 = vld [vmem:[%s6807_s1 + $0x68] sm:$0xff]  ;;  %v5487_v43 = vpack.c.bf16 %v982_v40, %v981_v39  ;;  %v983_v45 = vld [vmem:[%s6807_s1 + $0x50] sm:$0xff] }
  0x39   : > { %5045 = vmatmul.mubr.msk.f32.vlgmr.msra.gmra.mrb[0].mxu0 %vm684_vm1, %v6030_v18  ;;  %v5493_v44 = vpack.c.bf16 %v986_v42, %v985_v41  ;;  %v984_v46 = vld [vmem:[%s6807_s1 + $0x58] sm:$0xff]  ;;  %v987_v47 = vld [vmem:[%s6807_s1 + $0x70] sm:$0xff]  ;;  %v1283_v0 = vld [vmem:[%s6762_s8 + $0x48] sm:$0xff] }
  0x3a   : > { %5056 = vmatmul.mubr.msk.f32.vlgmr.msra.gmra.mrb[0].mxu1 %vm684_vm1, %v6030_v18  ;;  %5464 = vmatpush3.bf16.msra.mxu0 %v5463_v19  ;;  %v988_v48 = vld [vmem:[%s6807_s1 + $0x78] sm:$0xff]  ;;  %v5490_v49 = vpack.c.bf16 %v984_v46, %v983_v45  ;;  %v1286_v1 = vld [vmem:[%s6762_s8 + $0x60] sm:$0xff]  ;;  %v1287_v2 = vld [vmem:[%s6762_s8 + $0x68] sm:$0xff]  ;;  %v5511_v5 = vpack.c.bf16 %v1283_v0, %v1282_v63  ;;  %s4781_s1 = sshll.u32 %s652_s28, 3 }
  0x3b   : > { %5470 = vmatpush3.bf16.msra.mxu1 %v5469_v20  ;;  %5465 = vmatprep.subr.bf16.mxu0 %v5804_v3  ;;  %v5496_v50 = vpack.c.bf16 %v988_v48, %v987_v47  ;;  %v6181_v4 = vld [vmem:[%s662_s25] sm:$0xff]  ;;  %v5517_v6 = vpack.c.bf16 %v1287_v2, %v1286_v1  ;;  %v1284_v7 = vld [vmem:[%s6762_s8 + $0x50] sm:$0xff]  ;;  %v1285_v8 = vld [vmem:[%s6762_s8 + $0x58] sm:$0xff]  ;;  %s6809_s25 = sld [smem:[#allocation21_spill]]  ;;  %s654_s27 = scalar_lea.vmem [#allocation8], %s4781_s1 }
  0x3c   : > { %5471 = vmatprep.subr.bf16.mxu1 %v5804_v3  ;;  %5066 = vmatprep.mubr.msk.f32.mxu0 %vm5805_vm0, %v5806_v11  ;;  %v1288_v9 = vld [vmem:[%s6762_s8 + $0x70] sm:$0xff]  ;;  %v1289_v10 = vld [vmem:[%s6762_s8 + $0x78] sm:$0xff]  ;;  %v5514_v12 = vpack.c.bf16 %v1285_v8, %v1284_v7  ;;  %v1577_v14 = vld [vmem:[%s6763_s9] sm:$0xff]  ;;  %s4694_s23 = sshll.u32 %s654_s27, 4  ;;  %s5725_s1 = sshll.u32 %s5807_s4, 4  ;;  %s6708_s23 = int_to_ptr.vmem [resolvable:$true] %s4694_s23  ;;  %s5726_s1 = int_to_ptr.vmem [resolvable:$false] %s5725_s1 }
  0x3d   : > { %5077 = vmatprep.mubr.msk.f32.mxu1 %vm5805_vm0, %v5806_v11  ;;  %v5520_v13 = vpack.c.bf16 %v1289_v10, %v1288_v9  ;;  %v1578_v15 = vld [vmem:[%s6763_s9 + $0x8] sm:$0xff]  ;;  %v1581_v16 = vld [vmem:[%s6763_s9 + $0x20] sm:$0xff]  ;;  %v1579_v21 = vld [vmem:[%s6763_s9 + $0x10] sm:$0xff]  ;;  %s5721_s22 = scalar_lea.vmem %s6708_s23, 128  ;;  %s5727_s2 = scalar_lea.vmem %s5726_s1, 256 }
  0x3e   : > { %5467 = vmatpush3.bf16.msra.mxu0 %v5466_v25  ;;  %v1582_v17 = vld [vmem:[%s6763_s9 + $0x28] sm:$0xff]  ;;  %v5523_v19 = vpack.c.bf16 %v1578_v15, %v1577_v14  ;;  %v1580_v22 = vld [vmem:[%s6763_s9 + $0x18] sm:$0xff]  ;;  %v1583_v23 = vld [vmem:[%s6763_s9 + $0x30] sm:$0xff]  ;;  %p5722_p3 = scmp.ne.s32.totalorder %s6708_s23, %s5721_s22  ;;  %p5728_p6 = scmp.lt.s32.totalorder %s6708_s23, %s5726_s1 }
  0x3f   : > { %5473 = vmatpush3.bf16.msra.mxu1 %v5472_v26  ;;  %5474 = vmatprep.subr.bf16.mxu0 %v5804_v3  ;;  %v5529_v20 = vpack.c.bf16 %v1582_v17, %v1581_v16  ;;  %v1584_v24 = vld [vmem:[%s6763_s9 + $0x38] sm:$0xff]  ;;  %v5526_v25 = vpack.c.bf16 %v1580_v22, %v1579_v21  ;;  %v1585_v27 = vld [vmem:[%s6763_s9 + $0x40] sm:$0xff]  ;;  %v1586_v28 = vld [vmem:[%s6763_s9 + $0x48] sm:$0xff]  ;;  %p5729_p7 = scmp.lt.s32.totalorder %s5727_s2, %s5721_s22 }
  0x40   : > { %5480 = vmatprep.subr.bf16.mxu1 %v5804_v3  ;;  %v5532_v26 = vpack.c.bf16 %v1584_v24, %v1583_v23  ;;  %v1589_v29 = vld [vmem:[%s6763_s9 + $0x60] sm:$0xff]  ;;  %v1590_v30 = vld [vmem:[%s6763_s9 + $0x68] sm:$0xff]  ;;  %v1587_v33 = vld [vmem:[%s6763_s9 + $0x50] sm:$0xff]  ;;  %p5723_p4 = pnand %p5722_p3, %p5961_p9 }
  0x41   : > { %5067 = vmatmul.mubr.msk.f32.vlgmr.msra.gmra.mrb[2].mxu0 %vm684_vm1, %v6030_v18  ;;  %v1588_v34 = vld [vmem:[%s6763_s9 + $0x58] sm:$0xff]  ;;  %v1591_v35 = vld [vmem:[%s6763_s9 + $0x70] sm:$0xff]  ;;  %v1885_v39 = vld [vmem:[%s6809_s25] sm:$0xff]  ;;  %p5730_p8 = por %p5729_p7, %p5728_p6 }
  0x42   : > { %5078 = vmatmul.mubr.msk.f32.vlgmr.msra.gmra.mrb[2].mxu1 %vm684_vm1, %v6030_v18  ;;  %5476 = vmatpush3.bf16.msra.mxu0 %v5475_v31  ;;  %v5535_v31 = vpack.c.bf16 %v1586_v28, %v1585_v27  ;;  %v1592_v36 = vld [vmem:[%s6763_s9 + $0x78] sm:$0xff]  ;;  %v1886_v40 = vld [vmem:[%s6809_s25 + $0x8] sm:$0xff]  ;;  %v1889_v41 = vld [vmem:[%s6809_s25 + $0x20] sm:$0xff]  ;;  %p5724_p5 = pneg %p5723_p4 }
  0x43   : > { %5482 = vmatpush3.bf16.msra.mxu1 %v5481_v32  ;;  %5477 = vmatprep.subr.bf16.mxu0 %v5804_v3  ;;  %v5541_v32 = vpack.c.bf16 %v1590_v30, %v1589_v29  ;;  %v1890_v42 = vld [vmem:[%s6809_s25 + $0x28] sm:$0xff]  ;;  %v1887_v45 = vld [vmem:[%s6809_s25 + $0x10] sm:$0xff]  ;;  %v1888_v46 = vld [vmem:[%s6809_s25 + $0x18] sm:$0xff] }
  0x44   : > { %5483 = vmatprep.subr.bf16.mxu1 %v5804_v3  ;;  %5088 = vmatprep.mubr.msk.f32.mxu0 %vm5805_vm0, %v5806_v11  ;;  %v1891_v47 = vld [vmem:[%s6809_s25 + $0x30] sm:$0xff]  ;;  %v1892_v48 = vld [vmem:[%s6809_s25 + $0x38] sm:$0xff]  ;;  %v1893_v51 = vld [vmem:[%s6809_s25 + $0x40] sm:$0xff]  ;;  %p5731_p10 = pnand %p5730_p8, %p5724_p5 }
  0x45   : > { %5099 = vmatprep.mubr.msk.f32.mxu1 %vm5805_vm0, %v5806_v11  ;;  %v1894_v52 = vld [vmem:[%s6809_s25 + $0x48] sm:$0xff]  ;;  %v1897_v53 = vld [vmem:[%s6809_s25 + $0x60] sm:$0xff]  ;;  %v1895_v57 = vld [vmem:[%s6809_s25 + $0x50] sm:$0xff] }
  0x46   : > { %5479 = vmatpush3.bf16.msra.mxu0 %v5478_v37  ;;  %v5538_v37 = vpack.c.bf16 %v1588_v34, %v1587_v33  ;;  %v1898_v54 = vld [vmem:[%s6809_s25 + $0x68] sm:$0xff]  ;;  %v1896_v58 = vld [vmem:[%s6809_s25 + $0x58] sm:$0xff]  ;;  %v1899_v59 = vld [vmem:[%s6809_s25 + $0x70] sm:$0xff] }
  0x47   : > { %5485 = vmatpush3.bf16.msra.mxu1 %v5484_v38  ;;  %5486 = vmatprep.subr.bf16.mxu0 %v5804_v3  ;;  %v5544_v38 = vpack.c.bf16 %v1592_v36, %v1591_v35  ;;  %v1900_v60 = vld [vmem:[%s6809_s25 + $0x78] sm:$0xff] }
  0x48   : > { %5492 = vmatprep.subr.bf16.mxu1 %v5804_v3 }
  0x49   : > { %5089 = vmatmul.mubr.msk.f32.vlgmr.msra.gmra.mrb[4].mxu0 %vm684_vm1, %v6030_v18 }
  0x4a   : > { %5100 = vmatmul.mubr.msk.f32.vlgmr.msra.gmra.mrb[4].mxu1 %vm684_vm1, %v6030_v18  ;;  %5488 = vmatpush3.bf16.msra.mxu0 %v5487_v43  ;;  %v5547_v43 = vpack.c.bf16 %v1886_v40, %v1885_v39 }
  0x4b   : > { %5494 = vmatpush3.bf16.msra.mxu1 %v5493_v44  ;;  %5489 = vmatprep.subr.bf16.mxu0 %v5804_v3  ;;  %v5553_v44 = vpack.c.bf16 %v1890_v42, %v1889_v41 }
  0x4c   : > { %5495 = vmatprep.subr.bf16.mxu1 %v5804_v3  ;;  %5110 = vmatprep.mubr.msk.f32.mxu0 %vm5805_vm0, %v5806_v11 }
  0x4d   : > { %5121 = vmatprep.mubr.msk.f32.mxu1 %vm5805_vm0, %v5806_v11 }
  0x4e   : > { %5491 = vmatpush3.bf16.msra.mxu0 %v5490_v49  ;;  %v5550_v49 = vpack.c.bf16 %v1888_v46, %v1887_v45 }
  0x4f   : > { %5497 = vmatpush3.bf16.msra.mxu1 %v5496_v50  ;;  %5498 = vmatprep.subr.bf16.mxu0 %v5804_v3  ;;  %v5556_v50 = vpack.c.bf16 %v1892_v48, %v1891_v47  ;;  %v1880_v48 = vlaneseq }
  0x50   : > { %5504 = vmatprep.subr.bf16.mxu1 %v5804_v3 }
  0x51   : > { %5111 = vmatmul.mubr.msk.f32.vlgmr.msra.gmra.mrb[6].mxu0 %vm684_vm1, %v6030_v18 }
  0x52   : > { %5122 = vmatmul.mubr.msk.f32.vlgmr.msra.gmra.mrb[6].mxu1 %vm684_vm1, %v6030_v18  ;;  %5500 = vmatpush3.bf16.msra.mxu0 %v5499_v55  ;;  %v5559_v55 = vpack.c.bf16 %v1894_v52, %v1893_v51  ;;  %v6399_v51 = vand.u32 127, %v1880_v48 }
  0x53   : > { %5506 = vmatpush3.bf16.msra.mxu1 %v5505_v56  ;;  %5501 = vmatprep.subr.bf16.mxu0 %v5804_v3  ;;  %v5565_v56 = vpack.c.bf16 %v1898_v54, %v1897_v53 }
  0x54   : > { %5507 = vmatprep.subr.bf16.mxu1 %v5804_v3  ;;  %5132 = vmatprep.mubr.msk.f32.mxu0 %vm5805_vm0, %v5806_v11 }
  0x55   : > { %5143 = vmatprep.mubr.msk.f32.mxu1 %vm5805_vm0, %v5806_v11 }
  0x56   : > { %5503 = vmatpush3.bf16.msra.mxu0 %v5502_v61  ;;  %v5562_v61 = vpack.c.bf16 %v1896_v58, %v1895_v57 }
  0x57   : > { %5509 = vmatpush3.bf16.msra.mxu1 %v5508_v62  ;;  %5510 = vmatprep.subr.bf16.mxu0 %v5804_v3  ;;  %v5568_v62 = vpack.c.bf16 %v1900_v60, %v1899_v59 }
  0x58   : > { %5516 = vmatprep.subr.bf16.mxu1 %v5804_v3 }
  0x59   : > { %5133 = vmatmul.mubr.msk.f32.vlgmr.msra.gmra.mrb[8].mxu0 %vm684_vm1, %v6181_v4 }
  0x5a   : > { %5144 = vmatmul.mubr.msk.f32.vlgmr.msra.gmra.mrb[8].mxu1 %vm684_vm1, %v6181_v4  ;;  %5512 = vmatpush3.bf16.msra.mxu0 %v5511_v5 }
  0x5b   : > { %5518 = vmatpush3.bf16.msra.mxu1 %v5517_v6  ;;  %5513 = vmatprep.subr.bf16.mxu0 %v5804_v3 }
  0x5c   : > { %5519 = vmatprep.subr.bf16.mxu1 %v5804_v3  ;;  %5154 = vmatprep.mubr.msk.f32.mxu0 %vm5805_vm0, %v5806_v11 }
  0x5d   : > { %5165 = vmatprep.mubr.msk.f32.mxu1 %vm5805_vm0, %v5806_v11 }
  0x5e   : > { %5515 = vmatpush3.bf16.msra.mxu0 %v5514_v12 }
  0x5f   : > { %5521 = vmatpush3.bf16.msra.mxu1 %v5520_v13  ;;  %5522 = vmatprep.subr.bf16.mxu0 %v5804_v3 }
  0x60   : > { %5528 = vmatprep.subr.bf16.mxu1 %v5804_v3 }
  0x61   : > { %5155 = vmatmul.mubr.msk.f32.vlgmr.msra.gmra.mrb[10].mxu0 %vm684_vm1, %v6181_v4 }
  0x62   : > { %5166 = vmatmul.mubr.msk.f32.vlgmr.msra.gmra.mrb[10].mxu1 %vm684_vm1, %v6181_v4  ;;  %5524 = vmatpush3.bf16.msra.mxu0 %v5523_v19 }
  0x63   : > { %5530 = vmatpush3.bf16.msra.mxu1 %v5529_v20  ;;  %5525 = vmatprep.subr.bf16.mxu0 %v5804_v3 }
  0x64   : > { %5531 = vmatprep.subr.bf16.mxu1 %v5804_v3  ;;  %5176 = vmatprep.mubr.msk.f32.mxu0 %vm5805_vm0, %v5806_v11 }
  0x65   : > { %5187 = vmatprep.mubr.msk.f32.mxu1 %vm5805_vm0, %v5806_v11 }
  0x66   : > { %5527 = vmatpush3.bf16.msra.mxu0 %v5526_v25 }
  0x67   : > { %5533 = vmatpush3.bf16.msra.mxu1 %v5532_v26  ;;  %5534 = vmatprep.subr.bf16.mxu0 %v5804_v3 }
  0x68   : > { %5540 = vmatprep.subr.bf16.mxu1 %v5804_v3 }
  0x69   : > { %5177 = vmatmul.mubr.msk.f32.vlgmr.msra.gmra.mrb[12].mxu0 %vm684_vm1, %v6181_v4 }
  0x6a   : > { %5188 = vmatmul.mubr.msk.f32.vlgmr.msra.gmra.mrb[12].mxu1 %vm684_vm1, %v6181_v4  ;;  %5536 = vmatpush3.bf16.msra.mxu0 %v5535_v31 }
  0x6b   : > { %5542 = vmatpush3.bf16.msra.mxu1 %v5541_v32  ;;  %5537 = vmatprep.subr.bf16.mxu0 %v5804_v3 }
  0x6c   : > { %5543 = vmatprep.subr.bf16.mxu1 %v5804_v3  ;;  %5198 = vmatprep.mubr.msk.f32.mxu0 %vm5805_vm0, %v5806_v11 }
  0x6d   : > { %5209 = vmatprep.mubr.msk.f32.mxu1 %vm5805_vm0, %v5806_v11 }
  0x6e   : > { %5539 = vmatpush3.bf16.msra.mxu0 %v5538_v37 }
  0x6f   : > { %5545 = vmatpush3.bf16.msra.mxu1 %v5544_v38  ;;  %5546 = vmatprep.subr.bf16.mxu0 %v5804_v3 }
  0x70   : > { %5552 = vmatprep.subr.bf16.mxu1 %v5804_v3 }
  0x71   : > { %5199 = vmatmul.mubr.msk.f32.vlgmr.msra.gmra.mrb[14].mxu0 %vm684_vm1, %v6181_v4 }
  0x72   : > { %5210 = vmatmul.mubr.msk.f32.vlgmr.msra.gmra.mrb[14].mxu1 %vm684_vm1, %v6181_v4  ;;  %5548 = vmatpush3.bf16.msra.mxu0 %v5547_v43 }
  0x73   : > { %5554 = vmatpush3.bf16.msra.mxu1 %v5553_v44  ;;  %5549 = vmatprep.subr.bf16.mxu0 %v5804_v3 }
  0x74   : > { %5555 = vmatprep.subr.bf16.mxu1 %v5804_v3  ;;  %5220 = vmatprep.mubr.msk.f32.mxu0 %vm5805_vm0, %v5806_v11 }
  0x75   : > { %5231 = vmatprep.mubr.msk.f32.mxu1 %vm5805_vm0, %v5806_v11 }
  0x76   : > { %5551 = vmatpush3.bf16.msra.mxu0 %v5550_v49  ;;  %v1881_v49 = vshrl.u32 %v1880_v48, 7 }
  0x77   : > { %5557 = vmatpush3.bf16.msra.mxu1 %v5556_v50  ;;  %5558 = vmatprep.subr.bf16.mxu0 %v5804_v3 }
  0x78   : > { %5564 = vmatprep.subr.bf16.mxu1 %v5804_v3  ;;  %v1884_v50 = vadd.s32 1, %v1881_v49 }
  0x79   : > { %5221 = vmatmul.mubr.msk.f32.vlgmr.msra.gmra.mrb[16].mxu0 %vm684_vm1, %v6030_v18 }
  0x7a   : > { %5232 = vmatmul.mubr.msk.f32.vlgmr.msra.gmra.mrb[16].mxu1 %vm684_vm1, %v6030_v18  ;;  %5560 = vmatpush3.bf16.msra.mxu0 %v5559_v55  ;;  %vm2500_vm3 = vcmp.lt.s32.totalorder %v6399_v51, %v1884_v50  ;;  %v2850_v50 = vld [vmem:[%s6810_s6 + $0x18] sm:$0xff] }
  0x7b   : > { %5566 = vmatpush3.bf16.msra.mxu1 %v5565_v56  ;;  %5561 = vmatprep.subr.bf16.mxu0 %v5804_v3 }
  0x7c   : > { %5567 = vmatprep.subr.bf16.mxu1 %v5804_v3  ;;  %5242 = vmatprep.mubr.msk.f32.mxu0 %vm5805_vm0, %v5806_v11 }
  0x7d   : > { %5253 = vmatprep.mubr.msk.f32.mxu1 %vm5805_vm0, %v5806_v11 }
  0x7e   : > { %5563 = vmatpush3.bf16.msra.mxu0 %v5562_v61 }
  0x7f   : > { %5569 = vmatpush3.bf16.msra.mxu1 %v5568_v62  ;;  %5256 = vmatprep.subr.mxu0 %v5806_v11 }
  0x80   : > { %5271 = vmatprep.subr.mxu1 %v5806_v11 }
  0x81   : > { %5243 = vmatmul.mubr.msk.f32.vlgmr.msra.gmra.mrb[18].mxu0 %vm684_vm1, %v6030_v18 }
  0x82   : > { %5254 = vmatmul.mubr.msk.f32.vlgmr.msra.gmra.mrb[18].mxu1 %vm684_vm1, %v6030_v18  ;;  %5258 = vmatprep.mubr.msk.f32.mxu0 %vm5805_vm0, %v5806_v11 }
  0x83   : > { %5273 = vmatprep.mubr.msk.f32.mxu1 %vm5805_vm0, %v5806_v11 }
 0x10c   : > { %v754_v63 = vpop.f32.mrb[0].mxu0 }
 0x10d   : > { %969 = vst.msk [vmem:[#allocation2] sm:$0xff] %vm968_vm2, %v754_v63  ;;  %v5046_v0 = vpop.f32.mrb[1].mxu0  ;;  %v824_v1 = vpop.f32.mrb[0].mxu1 }
 0x10e   : > { %970 = vst.msk [vmem:[#allocation2 + $0x8] sm:$0xff] %vm968_vm2, %v824_v1  ;;  %v5057_v2 = vpop.f32.mrb[1].mxu1 }
 0x114   : > { %v894_v4 = vpop.f32.mrb[2].mxu0  ;;  %v2185_v5 = vld [vmem:[#allocation2] sm:$0xff] }
 0x115   : > { %971 = vst.msk [vmem:[#allocation2 + $0x10] sm:$0xff] %vm968_vm2, %v894_v4  ;;  %v5068_v6 = vpop.f32.mrb[3].mxu0  ;;  %5257 = vmatpush3.xpose.msk.msra.mxu0 %vm968_vm2, %v2185_v5  ;;  %v964_v7 = vpop.f32.mrb[2].mxu1  ;;  %v2186_v38 = vld [vmem:[#allocation2 + $0x8] sm:$0xff] }
 0x116   : > { %972 = vst.msk [vmem:[#allocation2 + $0x18] sm:$0xff] %vm968_vm2, %v964_v7  ;;  %v5079_v8 = vpop.f32.mrb[3].mxu1  ;;  %5261 = vmatprep.subr.mxu0 %v5806_v11 }
 0x11c   : > { %v1055_v9 = vpop.f32.mrb[4].mxu0  ;;  %v2187_v41 = vld [vmem:[#allocation2 + $0x10] sm:$0xff] }
 0x11d   : > { %1269 = vst.msk [vmem:[#allocation3] sm:$0xff] %vm968_vm2, %v1055_v9  ;;  %v5090_v10 = vpop.f32.mrb[5].mxu0  ;;  %v1125_v12 = vpop.f32.mrb[4].mxu1  ;;  %v2188_v13 = vld [vmem:[#allocation2 + $0x18] sm:$0xff] }
 0x11e   : > { %1270 = vst.msk [vmem:[#allocation3 + $0x8] sm:$0xff] %vm968_vm2, %v1125_v12  ;;  %v5101_v14 = vpop.f32.mrb[5].mxu1  ;;  %5272 = vmatpush3.xpose.msk.msra.mxu1 %vm968_vm2, %v2188_v13 }
 0x11f   : > { %5281 = vmatprep.subr.mxu1 %v5806_v11 }
 0x124   : > { %v1195_v15 = vpop.f32.mrb[6].mxu0  ;;  %v2551_v45 = vld [vmem:[#allocation3] sm:$0xff] }
 0x125   : > { %1271 = vst.msk [vmem:[#allocation3 + $0x10] sm:$0xff] %vm968_vm2, %v1195_v15  ;;  %v5112_v16 = vpop.f32.mrb[7].mxu0  ;;  %v1265_v17 = vpop.f32.mrb[6].mxu1  ;;  %v2552_v46 = vld [vmem:[#allocation3 + $0x8] sm:$0xff] }
 0x126   : > { %1272 = vst.msk [vmem:[#allocation3 + $0x18] sm:$0xff] %vm968_vm2, %v1265_v17  ;;  %v5123_v19 = vpop.f32.mrb[7].mxu1 }
 0x12c   : > { %v1359_v20 = vpop.f32.mrb[8].mxu0 }
 0x12d   : > { %1573 = vst.msk [vmem:[#allocation4] sm:$0xff] %vm968_vm2, %v1359_v20  ;;  %v5134_v21 = vpop.f32.mrb[9].mxu0  ;;  %v1429_v22 = vpop.f32.mrb[8].mxu1 }
 0x12e   : > { %1574 = vst.msk [vmem:[#allocation4 + $0x8] sm:$0xff] %vm968_vm2, %v1429_v22  ;;  %v5145_v23 = vpop.f32.mrb[9].mxu1 }
 0x134   : > { %v1499_v24 = vpop.f32.mrb[10].mxu0 }
 0x135   : > { %1575 = vst.msk [vmem:[#allocation4 + $0x10] sm:$0xff] %vm968_vm2, %v1499_v24  ;;  %v5156_v25 = vpop.f32.mrb[11].mxu0  ;;  %v1569_v26 = vpop.f32.mrb[10].mxu1 }
 0x136   : > { %1576 = vst.msk [vmem:[#allocation4 + $0x18] sm:$0xff] %vm968_vm2, %v1569_v26  ;;  %v5167_v27 = vpop.f32.mrb[11].mxu1 }
 0x13c   : > { %v1659_v28 = vpop.f32.mrb[12].mxu0 }
 0x13d   : > { %1873 = vst.msk [vmem:[#allocation5] sm:$0xff] %vm968_vm2, %v1659_v28  ;;  %v5178_v29 = vpop.f32.mrb[13].mxu0  ;;  %v1729_v30 = vpop.f32.mrb[12].mxu1 }
 0x13e   : > { %1874 = vst.msk [vmem:[#allocation5 + $0x8] sm:$0xff] %vm968_vm2, %v1729_v30  ;;  %v5189_v31 = vpop.f32.mrb[13].mxu1 }
 0x144   : > { %v1799_v32 = vpop.f32.mrb[14].mxu0 }
 0x145   : > { %1875 = vst.msk [vmem:[#allocation5 + $0x10] sm:$0xff] %vm968_vm2, %v1799_v32  ;;  %v5200_v33 = vpop.f32.mrb[15].mxu0  ;;  %v1869_v34 = vpop.f32.mrb[14].mxu1 }
 0x146   : > { %1876 = vst.msk [vmem:[#allocation5 + $0x18] sm:$0xff] %vm968_vm2, %v1869_v34  ;;  %v5211_v35 = vpop.f32.mrb[15].mxu1 }
 0x14c   : > { %v1971_v36 = vpop.f32.mrb[16].mxu0 }
 0x14d   : > { %v5222_v37 = vpop.f32.mrb[17].mxu0  ;;  %5259 = vmatmul.mubr.msk.f32.vlgmr.msra.gmra.mrb[20].mxu0 %vm968_vm2, %v1971_v36  ;;  %v2041_v39 = vpop.f32.mrb[16].mxu1 }
 0x14e   : > { %5262 = vmatpush3.xpose.msk.msra.mxu0 %vm968_vm2, %v2186_v38  ;;  %v5233_v40 = vpop.f32.mrb[17].mxu1  ;;  %5263 = vmatprep.mubr.msk.f32.mxu0 %vm5805_vm0, %v5806_v11  ;;  %v2553_v37 = vld [vmem:[#allocation3 + $0x10] sm:$0xff] }
 0x14f   : > { %5266 = vmatprep.subr.mxu0 %v5806_v11  ;;  %v2554_v40 = vld [vmem:[#allocation3 + $0x18] sm:$0xff] }
 0x151   : > { %5264 = vmatmul.mubr.msk.f32.vlgmr.msra.gmra.mrb[22].mxu0 %vm968_vm2, %v2041_v39 }
 0x152   : > { %5267 = vmatpush3.xpose.msk.msra.mxu0 %vm968_vm2, %v2187_v41  ;;  %5268 = vmatprep.mubr.msk.f32.mxu0 %vm5805_vm0, %v5806_v11 }
 0x153   : > { %5276 = vmatprep.subr.mxu0 %v5806_v11 }
 0x154   : > { %v2111_v42 = vpop.f32.mrb[18].mxu0 }
 0x155   : > { %v2181_v43 = vpop.f32.mrb[18].mxu1  ;;  %v5244_v44 = vpop.f32.mrb[19].mxu0  ;;  %5269 = vmatmul.mubr.msk.f32.vlgmr.msra.gmra.mrb[24].mxu0 %vm968_vm2, %v2111_v42 }
 0x156   : > { %5274 = vmatmul.mubr.msk.f32.vlgmr.msra.gmra.mrb[20].mxu1 %vm968_vm2, %v2181_v43  ;;  %5277 = vmatpush3.msra.mxu0 %v2551_v45  ;;  %v5255_v47 = vpop.f32.mrb[19].mxu1  ;;  %v2847_v45 = vld [vmem:[%s6810_s6] sm:$0xff] }
 0x157   : > { %5282 = vmatpush3.msra.mxu1 %v2552_v46  ;;  %5278 = vmatprep.mubr.msk.f32.mxu0 %vm5805_vm0, %v5806_v11  ;;  %v2848_v46 = vld [vmem:[%s6810_s6 + $0x8] sm:$0xff]  ;;  %v2849_v47 = vld [vmem:[%s6810_s6 + $0x10] sm:$0xff]  ;;  %s6815_s6 = sld [smem:[#allocation27_spill]] }
 0x158   : > { %5286 = vmatprep.subr.mxu0 %v5806_v11  ;;  %5283 = vmatprep.mubr.msk.f32.mxu1 %vm5805_vm0, %v5806_v11 }
 0x159   : > { %5291 = vmatprep.subr.mxu1 %v5806_v11 }
 0x220   : > { %v2262_v52 = vpop.f32.mrb[20].mxu0 }
 0x221   : > { %v2494_v53 = vmul.f32 0.35355338, %v2262_v52  ;;  %v5260_v54 = vpop.f32.mrb[21].mxu0 }
 0x223   : > { %v2503_v55 = vsel %vm2500_vm3, %v2494_v53, -1000000.0 }
 0x224   : > { %v2338_v56 = vpop.f32.mrb[22].mxu0  ;;  %v2507_v57 = vsel %vm968_vm2, %v2503_v55, -inf }
 0x225   : > { %v2495_v58 = vmul.f32 0.35355338, %v2338_v56  ;;  %2508 = vmax.xlane.f32.xlu0 %v2507_v57  ;;  %v5265_v59 = vpop.f32.mrb[23].mxu0 }
 0x227   : > { %v2504_v60 = vsel %vm2500_vm3, %v2495_v58, -1000000.0 }
 0x228   : > { %v2414_v61 = vpop.f32.mrb[24].mxu0  ;;  %v2510_v62 = vsel %vm968_vm2, %v2504_v60, -inf }
 0x229   : > { %v2496_v63 = vmul.f32 0.35355338, %v2414_v61  ;;  %2511 = vmax.xlane.f32.xlu0 %v2510_v62  ;;  %v5270_v0 = vpop.f32.mrb[25].mxu0  ;;  %v2490_v1 = vpop.f32.mrb[20].mxu1 }
 0x22a   : > { %v2497_v2 = vmul.f32 0.35355338, %v2490_v1  ;;  %v5275_v4 = vpop.f32.mrb[21].mxu1 }
 0x22b   : > { %v2505_v5 = vsel %vm2500_vm3, %v2496_v63, -1000000.0 }
 0x22c   : > { %v2513_v6 = vsel %vm968_vm2, %v2505_v5, -inf  ;;  %v2506_v7 = vsel %vm2500_vm3, %v2497_v2, -1000000.0 }
 0x22d   : > { %2514 = vmax.xlane.f32.xlu1 %v2513_v6  ;;  %v2516_v8 = vsel %vm968_vm2, %v2506_v7, -inf }
 0x231   : > { %2517 = vmax.xlane.f32.xlu1 %v2516_v8 }
 0x2b2   : > { %v2509_v9 = vpop.xlane.xlu0 %2508 }
 0x2b3   : > { %v2519_v10 = vsub.f32 %v2503_v55, %v2509_v9 }
 0x2b5   : > { %v2523_v12 = vmul.f32 1.442695, %v2519_v10 }
 0x2b6   : > { %v2512_v13 = vpop.xlane.xlu0 %2511 }
 0x2b7   : > { %5671 = vpow2.f32 %v2523_v12  ;;  %v2520_v14 = vsub.f32 %v2504_v60, %v2512_v13 }
 0x2b9   : > { %v2525_v15 = vmul.f32 1.442695, %v2520_v14 }
 0x2ba   : > { %v2515_v16 = vpop.xlane.xlu1 %2514 }
 0x2bb   : > { %5673 = vpow2.f32 %v2525_v15  ;;  %v2521_v17 = vsub.f32 %v2505_v5, %v2515_v16 }
 0x2bd   : > { %v2527_v19 = vmul.f32 1.442695, %v2521_v17 }
 0x2be   : > { %v2518_v20 = vpop.xlane.xlu1 %2517 }
 0x2bf   : > { %5675 = vpow2.f32 %v2527_v19  ;;  %v2522_v21 = vsub.f32 %v2506_v7, %v2518_v20  ;;  %v3182_v19 = vld [vmem:[%s6811_s7] sm:$0xff]  ;;  %v3183_v20 = vld [vmem:[%s6811_s7 + $0x8] sm:$0xff] }
 0x2c1   : > { %v5672_v22 = vpop.eup %5671  ;;  %v2529_v23 = vmul.f32 1.442695, %v2522_v21  ;;  %v5571_v21 = vpack.c.bf16 %v3183_v20, %v3182_v19 }
 0x2c2   : > { %v2531_v24 = vsel %vm968_vm2, %v5672_v22, 0.0 }
 0x2c3   : > { %5677 = vpow2.f32 %v2529_v23  ;;  %2532 = vadd.xlane.f32.xlu0 %v2531_v24  ;;  %v3184_v24 = vld [vmem:[%s6811_s7 + $0x10] sm:$0xff] }
 0x2c5   : > { %v5674_v25 = vpop.eup %5673 }
 0x2c6   : > { %v2534_v26 = vsel %vm968_vm2, %v5674_v25, 0.0 }
 0x2c7   : > { %2535 = vadd.xlane.f32.xlu1 %v2534_v26  ;;  %v3188_v26 = vld [vmem:[%s6811_s7 + $0x30] sm:$0xff] }
 0x2c9   : > { %v5676_v27 = vpop.eup %5675 }
 0x2ca   : > { %v2537_v28 = vsel %vm968_vm2, %v5676_v27, 0.0 }
 0x2cb   : > { %2538 = vadd.xlane.f32.xlu0 %v2537_v28  ;;  %v3189_v28 = vld [vmem:[%s6811_s7 + $0x38] sm:$0xff] }
 0x2cd   : > { %v5678_v29 = vpop.eup %5677 }
 0x2ce   : > { %v2540_v30 = vsel %vm968_vm2, %v5678_v29, 0.0 }
 0x2cf   : > { %2541 = vadd.xlane.f32.xlu1 %v2540_v30 }
 0x350   : > { %v2533_v31 = vpop.xlane.xlu0 %2532 }
 0x351   : > { %5679 = vrcp.f32 %v2533_v31 }
 0x354   : > { %v2536_v32 = vpop.xlane.xlu1 %2535 }
 0x355   : > { %5681 = vrcp.f32 %v2536_v32 }
 0x358   : > { %v2539_v33 = vpop.xlane.xlu0 %2538 }
 0x359   : > { %5683 = vrcp.f32 %v2539_v33 }
 0x35b   : > { %v5680_v34 = vpop.eup %5679 }
 0x35c   : > { %v2547_v35 = vmul.f32 %v5680_v34, %v5672_v22  ;;  %v2542_v36 = vpop.xlane.xlu1 %2541  ;;  %v3187_v22 = vld [vmem:[%s6811_s7 + $0x28] sm:$0xff]  ;;  %v4820_v34 = vld [vmem:[%s6769_s15] ss:$0 sm:$0xff] }
 0x35d   : > { %5685 = vrcp.f32 %v2542_v36 }
 0x35e   : > { %5279 = vmatmul.mubr.msk.f32.vlgmr.msra.gmra.mrb[26].mxu0 %vm968_vm2, %v2547_v35  ;;  %v3190_v35 = vld [vmem:[%s6811_s7 + $0x40] sm:$0xff] }
 0x35f   : > { %v5682_v38 = vpop.eup %5681  ;;  %5287 = vmatpush3.msra.mxu0 %v2553_v37  ;;  %5288 = vmatprep.mubr.msk.f32.mxu0 %vm5805_vm0, %v5806_v11  ;;  %v3191_v37 = vld [vmem:[%s6811_s7 + $0x48] sm:$0xff] }
 0x360   : > { %v2548_v39 = vmul.f32 %v5682_v38, %v5674_v25  ;;  %5296 = vmatprep.subr.mxu0 %v5806_v11  ;;  %v3185_v25 = vld [vmem:[%s6811_s7 + $0x18] sm:$0xff]  ;;  %v3194_v38 = vld [vmem:[%s6811_s7 + $0x60] sm:$0xff] }
 0x362   : > { %5284 = vmatmul.mubr.msk.f32.vlgmr.msra.gmra.mrb[22].mxu1 %vm968_vm2, %v2548_v39  ;;  %v3195_v39 = vld [vmem:[%s6811_s7 + $0x68] sm:$0xff] }
 0x363   : > { %v5684_v41 = vpop.eup %5683  ;;  %5292 = vmatpush3.msra.mxu1 %v2554_v40  ;;  %5293 = vmatprep.mubr.msk.f32.mxu1 %vm5805_vm0, %v5806_v11  ;;  %v4821_v40 = vld [vmem:[%s6770_s16] ss:$0 sm:$0xff] }
 0x364   : > { %v2549_v42 = vmul.f32 %v5684_v41, %v5676_v27  ;;  %5301 = vmatprep.subr.mxu1 %v5806_v11  ;;  %v5574_v27 = vpack.c.bf16 %v3185_v25, %v3184_v24 }
 0x366   : > { %5289 = vmatmul.mubr.msk.f32.vlgmr.msra.gmra.mrb[28].mxu0 %vm968_vm2, %v2549_v42  ;;  %v5583_v42 = vpack.c.bf16 %v3191_v37, %v3190_v35 }
 0x367   : > { %v5686_v43 = vpop.eup %5685  ;;  %5298 = vmatprep.mubr.msk.f32.mxu0 %vm5805_vm0, %v5806_v11  ;;  %5297 = vmatpush3.msra.mxu0 %v2847_v45 }
 0x368   : > { %v2550_v44 = vmul.f32 %v5686_v43, %v5678_v29  ;;  %5306 = vmatprep.subr.mxu0 %v5806_v11  ;;  %v5580_v29 = vpack.c.bf16 %v3189_v28, %v3188_v26  ;;  %v5589_v43 = vpack.c.bf16 %v3195_v39, %v3194_v38 }
 0x36a   : > { %5294 = vmatmul.mubr.msk.f32.vlgmr.msra.gmra.mrb[24].mxu1 %vm968_vm2, %v2550_v44  ;;  %v3192_v44 = vld [vmem:[%s6811_s7 + $0x50] sm:$0xff] }
 0x36b   : > { %5303 = vmatprep.mubr.msk.f32.mxu1 %vm5805_vm0, %v5806_v11  ;;  %5302 = vmatpush3.msra.mxu1 %v2848_v46  ;;  %v3193_v46 = vld [vmem:[%s6811_s7 + $0x58] sm:$0xff] }
 0x36c   : > { %5311 = vmatprep.subr.mxu1 %v5806_v11 }
 0x431   : > { %v2624_v48 = vpop.f32.mrb[26].mxu0 }
 0x432   : > { %v5280_v49 = vpop.f32.mrb[27].mxu0  ;;  %5299 = vmatmul.mubr.msk.f32.vlgmr.msra.gmra.mrb[30].mxu0 %vm968_vm2, %v2624_v48  ;;  %v3197_v48 = vld [vmem:[%s6811_s7 + $0x78] sm:$0xff] }
 0x433   : > { %5307 = vmatpush3.msra.mxu0 %v2849_v47  ;;  %5308 = vmatprep.mubr.msk.f32.mxu0 %vm5805_vm0, %v5806_v11  ;;  %v3196_v47 = vld [vmem:[%s6811_s7 + $0x70] sm:$0xff]  ;;  %v5586_v49 = vpack.c.bf16 %v3193_v46, %v3192_v44 }
 0x434   : > { %5570 = vmatprep.subr.bf16.mxu0 %v5804_v3 }
 0x435   : > { %v2697_v52 = vpop.f32.mrb[22].mxu1 }
 0x436   : > { %v5285_v53 = vpop.f32.mrb[23].mxu1  ;;  %5304 = vmatmul.mubr.msk.f32.vlgmr.msra.gmra.mrb[26].mxu1 %vm968_vm2, %v2697_v52  ;;  %v3481_v52 = vld [vmem:[#allocation4] sm:$0xff] }
 0x437   : > { %5312 = vmatpush3.msra.mxu1 %v2850_v50  ;;  %5313 = vmatprep.mubr.msk.f32.mxu1 %vm5805_vm0, %v5806_v11  ;;  %v5592_v50 = vpack.c.bf16 %v3197_v48, %v3196_v47  ;;  %v3482_v53 = vld [vmem:[#allocation4 + $0x8] sm:$0xff] }
 0x438   : > { %5576 = vmatprep.subr.bf16.mxu1 %v5804_v3 }
 0x439   : > { %v2770_v54 = vpop.f32.mrb[28].mxu0 }
 0x43a   : > { %v5290_v55 = vpop.f32.mrb[29].mxu0  ;;  %5309 = vmatmul.mubr.msk.f32.vlgmr.msra.gmra.mrb[32].mxu0 %vm968_vm2, %v2770_v54 }
 0x43b   : > { %5324 = vmatprep.mubr.msk.f32.mxu0 %vm5805_vm0, %v5806_v11  ;;  %5572 = vmatpush3.bf16.msra.mxu0 %v5571_v21 }
 0x43c   : > { %5573 = vmatprep.subr.bf16.mxu0 %v5804_v3 }
 0x43d   : > { %v2843_v56 = vpop.f32.mrb[24].mxu1 }
 0x43e   : > { %v5295_v57 = vpop.f32.mrb[25].mxu1  ;;  %5314 = vmatmul.mubr.msk.f32.vlgmr.msra.gmra.mrb[28].mxu1 %vm968_vm2, %v2843_v56 }
 0x43f   : > { %5335 = vmatprep.mubr.msk.f32.mxu1 %vm5805_vm0, %v5806_v11  ;;  %5575 = vmatpush3.bf16.msra.mxu0 %v5574_v27 }
 0x440   : > { %5582 = vmatprep.subr.bf16.mxu0 %v5804_v3 }
 0x505   : > { %v2920_v58 = vpop.f32.mrb[30].mxu0 }
 0x506   : > { %v5300_v59 = vpop.f32.mrb[31].mxu0  ;;  %v3143_v61 = vsel %vm684_vm1, %v2920_v58, 0.0  ;;  %v3483_v58 = vld [vmem:[#allocation4 + $0x10] sm:$0xff] }
 0x507   : > { %v3484_v59 = vld [vmem:[#allocation4 + $0x18] sm:$0xff] }
 0x509   : > { %v2993_v60 = vpop.f32.mrb[26].mxu1 }
 0x50a   : > { %v3144_v62 = vsel %vm684_vm1, %v2993_v60, 0.0  ;;  %v5305_v63 = vpop.f32.mrb[27].mxu1 }
 0x50b   : > { %v3145_v0 = vadd.f32 %v3144_v62, %v3143_v61 }
 0x50d   : > { %v3066_v1 = vpop.f32.mrb[32].mxu0 }
 0x50e   : > { %v3146_v2 = vsel %vm684_vm1, %v3066_v1, 0.0  ;;  %v5310_v4 = vpop.f32.mrb[33].mxu0  ;;  %v3846_v1 = vld [vmem:[#allocation5 + $0x8] sm:$0xff] }
 0x50f   : > { %v3147_v5 = vadd.f32 %v3146_v2, %v3145_v0  ;;  %v3845_v0 = vld [vmem:[#allocation5] sm:$0xff]  ;;  %v3793_v2 = vstv %s3181_s0  ;;  %s4680_s0 = scalar_lea.sflag [#allocation9], %s652_s28 }
 0x510   : > { %vm6571_vm4 = vcmp.lt.s32.totalorder %v6399_v51, %v3793_v2 }
 0x511   : > { %v3139_v6 = vpop.f32.mrb[28].mxu1 }
 0x512   : > { %v3148_v7 = vsel %vm684_vm1, %v3139_v6, 0.0  ;;  %v5315_v8 = vpop.f32.mrb[29].mxu1 }
 0x513   : > { %v3149_v9 = vadd.f32 %v3148_v7, %v3147_v5 }
 0x515   : > { %v3150_v10 = vadd.f32 %v3149_v9, %v6030_v18  ;;  %v3186_v18 = vld [vmem:[%s6811_s7 + $0x20] sm:$0xff]  ;;  %s6706_s7 = scalar_lea.hbm %s6815_s6, %s4851_s26 }
 0x516   : > { %v5577_v23 = vpack.c.bf16 %v3187_v22, %v3186_v18 }
 0x517   : > { %v3153_v12 = vsel %vm684_vm1, %v3150_v10, 0.0 }
 0x518   : > { %3154 = vadd.xlane.f32.xlu0 %v3153_v12  ;;  %5578 = vmatpush3.bf16.msra.mxu1 %v5577_v23 }
 0x519   : > { %5579 = vmatprep.subr.bf16.mxu1 %v5804_v3 }
 0x51c   : > { %5581 = vmatpush3.bf16.msra.mxu1 %v5580_v29 }
 0x51d   : > { %5588 = vmatprep.subr.bf16.mxu1 %v5804_v3 }
 0x5a5   : > { %v3155_v13 = vpop.xlane.xlu0 %3154 }
 0x5a6   : > { %v3157_v14 = vmul.f32 0.03125, %v3155_v13 }
 0x5a8   : > { %v3158_v15 = vsub.f32 %v3150_v10, %v3157_v14 }
 0x5aa   : > { %v3159_v16 = vmul.f32 %v3158_v15, %v3158_v15 }
 0x5ac   : > { %v3160_v17 = vsel %vm684_vm1, %v3159_v16, 0.0 }
 0x5ad   : > { %3161 = vadd.xlane.f32.xlu1 %v3160_v17 }
 0x63a   : > { %v3162_v30 = vpop.xlane.xlu1 %3161 }
 0x63b   : > { %v3163_v31 = vmul.f32 0.03125, %v3162_v30 }
 0x63d   : > { %v3164_v32 = vadd.f32 1e-05, %v3163_v31 }
 0x63f   : > { %5687 = vrsqrt.f32 %v3164_v32 }
 0x649   : > { %v5688_v33 = vpop.eup %5687 }
 0x64a   : > { %v3166_v36 = vmul.f32 %v5688_v33, %v3158_v15 }
 0x64c   : > { %v3173_v41 = vmul.f32 %v4820_v34, %v3166_v36 }
 0x64e   : > { %v6516_v45 = vadd.f32 %v4821_v40, %v3173_v41 }
 0x650   : > { %5325 = vmatmul.mubr.msk.f32.vlgmr.msra.gmra.mrb[34].mxu0 %vm684_vm1, %v6516_v45  ;;  %5336 = vmatmul.mubr.msk.f32.vlgmr.msra.gmra.mrb[30].mxu1 %vm684_vm1, %v6516_v45 }
 0x651   : > { %5584 = vmatpush3.bf16.msra.mxu0 %v5583_v42  ;;  %5590 = vmatpush3.bf16.msra.mxu1 %v5589_v43 }
 0x652   : > { %5585 = vmatprep.subr.bf16.mxu0 %v5804_v3  ;;  %5591 = vmatprep.subr.bf16.mxu1 %v5804_v3 }
 0x653   : > { %5346 = vmatprep.mubr.msk.f32.mxu0 %vm5805_vm0, %v5806_v11  ;;  %5357 = vmatprep.mubr.msk.f32.mxu1 %vm5805_vm0, %v5806_v11 }
 0x655   : > { %5587 = vmatpush3.bf16.msra.mxu0 %v5586_v49  ;;  %5593 = vmatpush3.bf16.msra.mxu1 %v5592_v50 }
 0x656   : > { %5360 = vmatprep.subr.mxu0 %v5806_v11  ;;  %5365 = vmatprep.subr.mxu1 %v5806_v11 }
 0x658   : > { %5347 = vmatmul.mubr.msk.f32.vlgmr.msra.gmra.mrb[36].mxu0 %vm684_vm1, %v6516_v45  ;;  %5358 = vmatmul.mubr.msk.f32.vlgmr.msra.gmra.mrb[32].mxu1 %vm684_vm1, %v6516_v45 }
 0x659   : > { %5362 = vmatprep.mubr.msk.f32.mxu0 %vm5805_vm0, %v5806_v11  ;;  %5367 = vmatprep.mubr.msk.f32.mxu1 %vm5805_vm0, %v5806_v11 }
 0x65e   : > { %5361 = vmatpush3.xpose.msk.msra.mxu0 %vm968_vm2, %v3481_v52  ;;  %5366 = vmatpush3.xpose.msk.msra.mxu1 %vm968_vm2, %v3482_v53 }
 0x65f   : > { %5370 = vmatprep.subr.mxu0 %v5806_v11  ;;  %5375 = vmatprep.subr.mxu1 %v5806_v11 }
 0x723   : > { %v3267_v54 = vpop.f32.mrb[34].mxu0  ;;  %v3337_v55 = vpop.f32.mrb[30].mxu1 }
 0x724   : > { %v5326_v56 = vpop.f32.mrb[35].mxu0  ;;  %v5337_v57 = vpop.f32.mrb[31].mxu1  ;;  %5363 = vmatmul.mubr.msk.f32.vlgmr.msra.gmra.mrb[38].mxu0 %vm968_vm2, %v3267_v54  ;;  %5368 = vmatmul.mubr.msk.f32.vlgmr.msra.gmra.mrb[34].mxu1 %vm968_vm2, %v3337_v55  ;;  %v3848_v55 = vld [vmem:[#allocation5 + $0x18] sm:$0xff] }
 0x725   : > { %5371 = vmatpush3.xpose.msk.msra.mxu0 %vm968_vm2, %v3483_v58  ;;  %5376 = vmatpush3.xpose.msk.msra.mxu1 %vm968_vm2, %v3484_v59  ;;  %v3847_v56 = vld [vmem:[#allocation5 + $0x10] sm:$0xff] }
 0x726   : > { %5372 = vmatprep.mubr.msk.f32.mxu0 %vm5805_vm0, %v5806_v11  ;;  %5377 = vmatprep.mubr.msk.f32.mxu1 %vm5805_vm0, %v5806_v11 }
 0x727   : > { %5380 = vmatprep.subr.mxu0 %v5806_v11  ;;  %5385 = vmatprep.subr.mxu1 %v5806_v11 }
 0x72b   : > { %v3407_v60 = vpop.f32.mrb[36].mxu0  ;;  %v3477_v61 = vpop.f32.mrb[32].mxu1 }
 0x72c   : > { %v5348_v62 = vpop.f32.mrb[37].mxu0  ;;  %v5359_v63 = vpop.f32.mrb[33].mxu1  ;;  %5373 = vmatmul.mubr.msk.f32.vlgmr.msra.gmra.mrb[40].mxu0 %vm968_vm2, %v3407_v60  ;;  %5378 = vmatmul.mubr.msk.f32.vlgmr.msra.gmra.mrb[36].mxu1 %vm968_vm2, %v3477_v61  ;;  %v4141_v61 = vld [vmem:[%s6764_s10] sm:$0xff] }
 0x72d   : > { %5381 = vmatpush3.msra.mxu0 %v3845_v0  ;;  %5386 = vmatpush3.msra.mxu1 %v3846_v1  ;;  %v4142_v62 = vld [vmem:[%s6764_s10 + $0x8] sm:$0xff]  ;;  %v4144_v63 = vld [vmem:[%s6764_s10 + $0x18] sm:$0xff]  ;;  %v4143_v1 = vld [vmem:[%s6764_s10 + $0x10] sm:$0xff] }
 0x72e   : > { %5382 = vmatprep.mubr.msk.f32.mxu0 %vm5805_vm0, %v5806_v11  ;;  %5387 = vmatprep.mubr.msk.f32.mxu1 %vm5805_vm0, %v5806_v11 }
 0x72f   : > { %5390 = vmatprep.subr.mxu0 %v5806_v11  ;;  %5395 = vmatprep.subr.mxu1 %v5806_v11 }
 0x7f7   : > { %v3557_v4 = vpop.f32.mrb[38].mxu0  ;;  %v3633_v5 = vpop.f32.mrb[34].mxu1 }
 0x7f8   : > { %v3789_v7 = vmul.f32 0.35355338, %v3557_v4  ;;  %v3790_v8 = vmul.f32 0.35355338, %v3633_v5  ;;  %v5364_v9 = vpop.f32.mrb[39].mxu0  ;;  %v5369_v10 = vpop.f32.mrb[35].mxu1 }
 0x7fa   : > { %v3798_v12 = vsel %vm6571_vm4, %v3790_v8, -1000000.0  ;;  %v3797_v13 = vsel %vm6571_vm4, %v3789_v7, -1000000.0 }
 0x7fb   : > { %v3804_v14 = vsel %vm968_vm2, %v3798_v12, -inf  ;;  %v3801_v15 = vsel %vm968_vm2, %v3797_v13, -inf }
 0x7fc   : > { %3805 = vmax.xlane.f32.xlu1 %v3804_v14  ;;  %3802 = vmax.xlane.f32.xlu0 %v3801_v15 }
 0x7ff   : > { %v3709_v51 = vpop.f32.mrb[40].mxu0  ;;  %v3785_v16 = vpop.f32.mrb[36].mxu1 }
 0x800   : > { %v3791_v17 = vmul.f32 0.35355338, %v3709_v51  ;;  %v3792_v19 = vmul.f32 0.35355338, %v3785_v16  ;;  %v5374_v20 = vpop.f32.mrb[41].mxu0  ;;  %v5379_v18 = vpop.f32.mrb[37].mxu1 }
 0x802   : > { %v3800_v21 = vsel %vm6571_vm4, %v3792_v19, -1000000.0  ;;  %v3799_v22 = vsel %vm6571_vm4, %v3791_v17, -1000000.0 }
 0x803   : > { %v3810_v23 = vsel %vm968_vm2, %v3800_v21, -inf  ;;  %v3807_v24 = vsel %vm968_vm2, %v3799_v22, -inf }
 0x804   : > { %3811 = vmax.xlane.f32.xlu1 %v3810_v23  ;;  %3808 = vmax.xlane.f32.xlu0 %v3807_v24 }
 0x889   : > { %v3806_v25 = vpop.xlane.xlu1 %3805  ;;  %v3803_v26 = vpop.xlane.xlu0 %3802 }
 0x88a   : > { %v3814_v27 = vsub.f32 %v3798_v12, %v3806_v25  ;;  %v3813_v28 = vsub.f32 %v3797_v13, %v3803_v26 }
 0x88c   : > { %v3819_v29 = vmul.f32 1.442695, %v3814_v27  ;;  %v3817_v30 = vmul.f32 1.442695, %v3813_v28 }
 0x88e   : > { %5689 = vpow2.f32 %v3819_v29 }
 0x88f   : > { %5691 = vpow2.f32 %v3817_v30 }
 0x891   : > { %v3812_v31 = vpop.xlane.xlu1 %3811  ;;  %v3809_v32 = vpop.xlane.xlu0 %3808 }
 0x892   : > { %v3816_v33 = vsub.f32 %v3800_v21, %v3812_v31  ;;  %v3815_v34 = vsub.f32 %v3799_v22, %v3809_v32  ;;  %v4474_v31 = vld [vmem:[%s6765_s11] sm:$0xff]  ;;  %v4475_v32 = vld [vmem:[%s6765_s11 + $0x8] sm:$0xff] }
 0x894   : > { %v3823_v35 = vmul.f32 1.442695, %v3816_v33  ;;  %v3821_v36 = vmul.f32 1.442695, %v3815_v34  ;;  %v5595_v33 = vpack.c.bf16 %v4475_v32, %v4474_v31  ;;  %v4477_v34 = vld [vmem:[%s6765_s11 + $0x18] sm:$0xff] }
 0x896   : > { %5693 = vpow2.f32 %v3823_v35 }
 0x897   : > { %5695 = vpow2.f32 %v3821_v36  ;;  %v4559_v36 = vld [vmem:[%s6767_s13] sm:$0xff] }
 0x898   : > { %v5690_v37 = vpop.eup %5689 }
 0x899   : > { %v5692_v38 = vpop.eup %5691  ;;  %v3828_v39 = vsel %vm968_vm2, %v5690_v37, 0.0 }
 0x89a   : > { %3829 = vadd.xlane.f32.xlu1 %v3828_v39  ;;  %v3825_v40 = vsel %vm968_vm2, %v5692_v38, 0.0 }
 0x89b   : > { %3826 = vadd.xlane.f32.xlu0 %v3825_v40  ;;  %v4562_v40 = vld [vmem:[%s6767_s13 + $0x18] sm:$0xff] }
 0x8a0   : > { %v5694_v41 = vpop.eup %5693 }
 0x8a1   : > { %v5696_v42 = vpop.eup %5695  ;;  %v3834_v43 = vsel %vm968_vm2, %v5694_v41, 0.0 }
 0x8a2   : > { %3835 = vadd.xlane.f32.xlu1 %v3834_v43  ;;  %v3831_v44 = vsel %vm968_vm2, %v5696_v42, 0.0  ;;  %v4564_v43 = vld [vmem:[%s6767_s13 + $0x28] sm:$0xff] }
 0x8a3   : > { %3832 = vadd.xlane.f32.xlu0 %v3831_v44 }
 0x927   : > { %v3830_v46 = vpop.xlane.xlu1 %3829 }
 0x928   : > { %5697 = vrcp.f32 %v3830_v46  ;;  %v3827_v47 = vpop.xlane.xlu0 %3826 }
 0x929   : > { %5699 = vrcp.f32 %v3827_v47 }
 0x92f   : > { %v3836_v48 = vpop.xlane.xlu1 %3835 }
 0x930   : > { %5701 = vrcp.f32 %v3836_v48  ;;  %v3833_v49 = vpop.xlane.xlu0 %3832 }
 0x931   : > { %5703 = vrcp.f32 %v3833_v49 }
 0x932   : > { %v5698_v50 = vpop.eup %5697 }
 0x933   : > { %v5700_v52 = vpop.eup %5699  ;;  %v3842_v53 = vmul.f32 %v5698_v50, %v5690_v37  ;;  %v4560_v37 = vld [vmem:[%s6767_s13 + $0x8] sm:$0xff]  ;;  %v4842_v50 = vld [vmem:[%s6771_s17] ss:$0 sm:$0xff] }
 0x934   : > { %v3841_v54 = vmul.f32 %v5700_v52, %v5692_v38  ;;  %v4561_v38 = vld [vmem:[%s6767_s13 + $0x10] sm:$0xff]  ;;  %v5601_v39 = vpack.c.bf16 %v4560_v37, %v4559_v36 }
 0x935   : > { %5388 = vmatmul.mubr.msk.f32.vlgmr.msra.gmra.mrb[38].mxu1 %vm968_vm2, %v3842_v53  ;;  %v4843_v53 = vld [vmem:[%s6772_s18] ss:$0 sm:$0xff] }
 0x936   : > { %5383 = vmatmul.mubr.msk.f32.vlgmr.msra.gmra.mrb[42].mxu0 %vm968_vm2, %v3841_v54  ;;  %5396 = vmatpush3.msra.mxu1 %v3848_v55 }
 0x937   : > { %5391 = vmatpush3.msra.mxu0 %v3847_v56  ;;  %5392 = vmatprep.mubr.msk.f32.mxu0 %vm5805_vm0, %v5806_v11  ;;  %v4566_v56 = vld [vmem:[%s6767_s13 + $0x38] sm:$0xff] }
 0x938   : > { %5397 = vmatprep.mubr.msk.f32.mxu1 %vm5805_vm0, %v5806_v11  ;;  %5400 = vmatprep.subr.mxu0 %v5806_v11 }
 0x939   : > { %5405 = vmatprep.subr.mxu1 %v5806_v11 }
 0x93a   : > { %v5702_v57 = vpop.eup %5701 }
 0x93b   : > { %v5704_v58 = vpop.eup %5703  ;;  %v3844_v59 = vmul.f32 %v5702_v57, %v5694_v41  ;;  %v5604_v41 = vpack.c.bf16 %v4562_v40, %v4561_v38 }
 0x93c   : > { %v3843_v60 = vmul.f32 %v5704_v58, %v5696_v42  ;;  %v4563_v42 = vld [vmem:[%s6767_s13 + $0x20] sm:$0xff] }
 0x93d   : > { %5398 = vmatmul.mubr.msk.f32.vlgmr.msra.gmra.mrb[40].mxu1 %vm968_vm2, %v3844_v59  ;;  %v5607_v44 = vpack.c.bf16 %v4564_v43, %v4563_v42  ;;  %v4844_v58 = vld [vmem:[%s6766_s12] ss:$0 sm:$0xff] }
 0x93e   : > { %5393 = vmatmul.mubr.msk.f32.vlgmr.msra.gmra.mrb[44].mxu0 %vm968_vm2, %v3843_v60  ;;  %5407 = vmatprep.mubr.msk.f32.mxu1 %vm5805_vm0, %v5806_v11 }
 0x93f   : > { %5402 = vmatprep.mubr.msk.f32.mxu0 %vm5805_vm0, %v5806_v11  ;;  %5401 = vmatpush3.msra.mxu0 %v4141_v61 }
 0x940   : > { %5406 = vmatpush3.msra.mxu1 %v4142_v62  ;;  %5410 = vmatprep.subr.mxu0 %v5806_v11 }
 0x941   : > { %5415 = vmatprep.subr.mxu1 %v5806_v11 }
 0xa08   : > { %v3991_v0 = vpop.f32.mrb[38].mxu1 }
 0xa09   : > { %v3918_v2 = vpop.f32.mrb[42].mxu0  ;;  %v5389_v4 = vpop.f32.mrb[39].mxu1  ;;  %5408 = vmatmul.mubr.msk.f32.vlgmr.msra.gmra.mrb[42].mxu1 %vm968_vm2, %v3991_v0 }
 0xa0a   : > { %v5384_v5 = vpop.f32.mrb[43].mxu0  ;;  %5403 = vmatmul.mubr.msk.f32.vlgmr.msra.gmra.mrb[46].mxu0 %vm968_vm2, %v3918_v2  ;;  %5416 = vmatpush3.msra.mxu1 %v4144_v63  ;;  %v4846_v63 = vld [vmem:[%s6814_s3] ss:$0 sm:$0xff] }
 0xa0b   : > { %5411 = vmatpush3.msra.mxu0 %v4143_v1  ;;  %5412 = vmatprep.mubr.msk.f32.mxu0 %vm5805_vm0, %v5806_v11 }
 0xa0c   : > { %5417 = vmatprep.mubr.msk.f32.mxu1 %vm5805_vm0, %v5806_v11  ;;  %5594 = vmatprep.subr.bf16.mxu0 %v5804_v3 }
 0xa0d   : > { %5600 = vmatprep.subr.bf16.mxu1 %v5804_v3 }
 0xa10   : > { %v4137_v6 = vpop.f32.mrb[40].mxu1 }
 0xa11   : > { %v4064_v7 = vpop.f32.mrb[44].mxu0  ;;  %v5399_v8 = vpop.f32.mrb[41].mxu1  ;;  %5418 = vmatmul.mubr.msk.f32.vlgmr.msra.gmra.mrb[44].mxu1 %vm968_vm2, %v4137_v6 }
 0xa12   : > { %v5394_v9 = vpop.f32.mrb[45].mxu0  ;;  %5413 = vmatmul.mubr.msk.f32.vlgmr.msra.gmra.mrb[48].mxu0 %vm968_vm2, %v4064_v7  ;;  %5447 = vmatprep.mubr.msk.f32.mxu1 %vm5805_vm0, %v5806_v11 }
 0xa13   : > { %5428 = vmatprep.mubr.msk.f32.mxu0 %vm5805_vm0, %v5806_v11  ;;  %5596 = vmatpush3.bf16.msra.mxu0 %v5595_v33 }
 0xa14   : > { %5597 = vmatprep.subr.bf16.mxu0 %v5804_v3  ;;  %5602 = vmatpush3.bf16.msra.mxu1 %v5601_v39 }
 0xa15   : > { %5603 = vmatprep.subr.bf16.mxu1 %v5804_v3 }
 0xa18   : > { %5605 = vmatpush3.bf16.msra.mxu1 %v5604_v41 }
 0xa19   : > { %5606 = vmatprep.subr.bf16.mxu1 %v5804_v3 }
 0xa1c   : > { %5608 = vmatpush3.bf16.msra.mxu1 %v5607_v44 }
 0xa1d   : > { %5609 = vmatprep.subr.bf16.mxu1 %v5804_v3  ;;  %v4565_v3 = vld [vmem:[%s6767_s13 + $0x30] sm:$0xff] }
 0xa1e   : > { %v5610_v57 = vpack.c.bf16 %v4566_v56, %v4565_v3 }
 0xa20   : > { %5611 = vmatpush3.bf16.msra.mxu1 %v5610_v57 }
 0xadc   : > { %v4287_v10 = vpop.f32.mrb[42].mxu1 }
 0xadd   : > { %v4214_v12 = vpop.f32.mrb[46].mxu0  ;;  %v4438_v13 = vsel %vm684_vm1, %v4287_v10, 0.0  ;;  %v5409_v14 = vpop.f32.mrb[43].mxu1 }
 0xade   : > { %v4437_v15 = vsel %vm684_vm1, %v4214_v12, 0.0  ;;  %v5404_v51 = vpop.f32.mrb[47].mxu0 }
 0xadf   : > { %v4439_v16 = vadd.f32 %v4438_v13, %v4437_v15  ;;  %v4848_v51 = vld [vmem:[%s6773_s19] ss:$0 sm:$0xff] }
 0xae4   : > { %v4433_v17 = vpop.f32.mrb[44].mxu1 }
 0xae5   : > { %v4360_v19 = vpop.f32.mrb[48].mxu0  ;;  %v5419_v20 = vpop.f32.mrb[45].mxu1  ;;  %v4442_v23 = vsel %vm684_vm1, %v4433_v17, 0.0  ;;  %v4849_v17 = vld [vmem:[%s6774_s20] ss:$0 sm:$0xff] }
 0xae6   : > { %v4440_v18 = vsel %vm684_vm1, %v4360_v19, 0.0  ;;  %v5414_v21 = vpop.f32.mrb[49].mxu0 }
 0xae7   : > { %v4441_v22 = vadd.f32 %v4440_v18, %v4439_v16 }
 0xae9   : > { %v4443_v24 = vadd.f32 %v4442_v23, %v4441_v22 }
 0xaeb   : > { %v4444_v11 = vadd.f32 %v4443_v24, %v6516_v45  ;;  %v4476_v45 = vld [vmem:[%s6765_s11 + $0x10] sm:$0xff] }
 0xaec   : > { %v5598_v35 = vpack.c.bf16 %v4477_v34, %v4476_v45 }
 0xaed   : > { %v4447_v25 = vsel %vm684_vm1, %v4444_v11, 0.0 }
 0xaee   : > { %4448 = vadd.xlane.f32.xlu0 %v4447_v25  ;;  %5599 = vmatpush3.bf16.msra.mxu0 %v5598_v35 }
 0xb7b   : > { %v4449_v26 = vpop.xlane.xlu0 %4448 }
 0xb7c   : > { %v4450_v27 = vmul.f32 0.03125, %v4449_v26 }
 0xb7e   : > { %v4451_v28 = vsub.f32 %v4444_v11, %v4450_v27 }
 0xb80   : > { %v4452_v29 = vmul.f32 %v4451_v28, %v4451_v28 }
 0xb82   : > { %v4453_v30 = vsel %vm684_vm1, %v4452_v29, 0.0 }
 0xb83   : > { %4454 = vadd.xlane.f32.xlu1 %v4453_v30 }
 0xc10   : > { %v4455_v46 = vpop.xlane.xlu1 %4454 }
 0xc11   : > { %v4456_v47 = vmul.f32 0.03125, %v4455_v46 }
 0xc13   : > { %v4457_v48 = vadd.f32 1e-05, %v4456_v47 }
 0xc15   : > { %5705 = vrsqrt.f32 %v4457_v48 }
 0xc1f   : > { %v5706_v49 = vpop.eup %5705 }
 0xc20   : > { %v4459_v52 = vmul.f32 %v5706_v49, %v4451_v28 }
 0xc22   : > { %v4466_v54 = vmul.f32 %v4842_v50, %v4459_v52 }
 0xc24   : > { %v4473_v55 = vadd.f32 %v4843_v53, %v4466_v54 }
 0xc26   : > { %5429 = vmatmul.mubr.msk.f32.vlgmr.msra.gmra.mrb[50].mxu0 %vm684_vm1, %v4473_v55 }
 0xcf9   : > { %v4554_v59 = vpop.f32.mrb[50].mxu0 }
 0xcfa   : > { %v4555_v60 = vadd.f32 %v4844_v58, %v4554_v59  ;;  %v5430_v61 = vpop.f32.mrb[51].mxu0 }
 0xcfc   : > { %v4558_v62 = vmax.f32 %v4555_v60, 0.0 }
 0xcfe   : > { %5448 = vmatmul.mubr.msk.f32.vlgmr.msra.gmra.mrb[46].mxu1 %vm4574_vm5, %v4558_v62 }
 0xdd1   : > { %v4644_v0 = vpop.f32.mrb[46].mxu1 }
 0xdd2   : > { %v4645_v1 = vadd.f32 %v4846_v63, %v4644_v0  ;;  %v5449_v2 = vpop.f32.mrb[47].mxu1 }
 0xdd4   : > { %v4648_v4 = vadd.f32 %v4645_v1, %v4473_v55 }
 0xdd6   : > { %v4651_v5 = vsel %vm684_vm1, %v4648_v4, 0.0 }
 0xdd7   : > { %4652 = vadd.xlane.f32.xlu0 %v4651_v5 }
 0xe64   : > { %v4653_v6 = vpop.xlane.xlu0 %4652 }
 0xe65   : > { %v4654_v7 = vmul.f32 0.03125, %v4653_v6 }
 0xe67   : > { %v4655_v8 = vsub.f32 %v4648_v4, %v4654_v7 }
 0xe69   : > { %v4656_v9 = vmul.f32 %v4655_v8, %v4655_v8 }
 0xe6b   : > { %v4657_v10 = vsel %vm684_vm1, %v4656_v9, 0.0 }
 0xe6c   : > { %4658 = vadd.xlane.f32.xlu1 %v4657_v10 }
 0xef9   : > { %v4659_v12 = vpop.xlane.xlu1 %4658 }
 0xefa   : > { %v4660_v13 = vmul.f32 0.03125, %v4659_v12 }
 0xefc   : > { %v4661_v14 = vadd.f32 1e-05, %v4660_v13 }
 0xefe   : > { %5707 = vrsqrt.f32 %v4661_v14 }
 0xf08   : > { %v5708_v15 = vpop.eup %5707 }
 0xf09   : > { %v4663_v16 = vmul.f32 %v5708_v15, %v4655_v8 }
 0xf0b   : > { %v4670_v19 = vmul.f32 %v4848_v51, %v4663_v16 }
 0xf0d   : > { %v4677_v20 = vadd.f32 %v4849_v17, %v4670_v19 }
 0xf0f   : > { %4678 = vst.msk [vmem:[%s654_s27] sm:$0xff] %vm684_vm1, %v4677_v20 }
 0xf10   : > { %5734 = shalt.err (!%p5731_p10)
}
 0xf11   : > { %s5735_s28 = scalar_lea.hbm %s6706_s7, 128  ;;  %s5739_s27 = scalar_lea.hbm %s6815_s6, 256 }
 0xf12   : > { %p5736_p11 = scmp.ne.s32.totalorder %s6706_s7, %s5735_s28  ;;  %p5740_p1 = scmp.lt.u32.totalorder %s6706_s7, %s6815_s6 }
 0xf13   : > { %p5741_p2 = scmp.lt.u32.totalorder %s5739_s27, %s5735_s28  ;;  %p5743_p4 = scmp.lt.u32.totalorder %s5735_s28, %s6706_s7 }
 0xf14   : > { %p5737_p12 = pnand %p5736_p11, %p5961_p9 }
 0xf15   : > { %p5742_p3 = por %p5741_p2, %p5740_p1 }
 0xf16   : > { %p5738_p0 = pneg %p5737_p12 }
 0xf17   : > { %p5744_p5 = por %p5743_p4, %p5742_p3 }
 0xf19   : > { %p5745_p6 = pnand %p5744_p5, %p5738_p0 }
 0xf1b   : > { %5748 = shalt.err (!%p5745_p6)
}
 0xf1c   : > { %5612 = dma.vmem_to_hbm [thread:$0]  (%p5961_p9), %s6708_s23, 128, %s6706_s7, %s4680_s0  }
 0xf1d PF: > { %s6816_s22 = sld [smem:[#allocation12_spill]]  ;;  %p5618_p7 = scmp.ge.s32.totalorder %s5801_s5, 2 }
 0xf1f   : > { %p5615_p8 = pnand %p5618_p7, %p5968_p13 }
 0xf23   : > { %s4706_s1 = sand.u32 1, %s6816_s22  }
 0xf24   : > { %s4707_s2 = scalar_lea.sflag [#allocation9], %s4706_s1 }
 0xf25   : > { %5776 = dma.done.wait (!%p5615_p8), %s4707_s2, 128  }
 0xf26   : > { %5778 = vsyncadd (!%p5615_p8), %s4707_s2, 4294967168  ;;  %s40_s5 = sadd.s32 1, %s5801_s5   ;;  %s6818_s30 = sld [smem:[#allocation13_spill]] }
 0xf27   : > { %p37_p10 = scmp.ge.s32.totalorder %s40_s5, 4   ;;  %s6819_s0 = sld [smem:[#allocation17_spill]] }
 0xf28   : > { %s6820_s4 = sld [smem:[#allocation14_spill]]  ;;  %s6821_s24 = sld [smem:[#allocation15_spill]] }
 0xf29   : > { %s6822_s28 = smov %s5785_s29  ;;  %39 = sbr.rel (!%p37_p10) target bundleno = 28 (0x1c), region = 143 }
 0xf2c   : > { %s6823_s29 = smov %s6818_s30 }
 0xf2e   : > { %s6824_s30 = smov %s6821_s24 }
 0xf30   :  { %4712 = vsyncpa [#allocation9], 1 }
 0xf31   :  { %4714 = vsyncpa [#allocation9 + $0x1], 1 }

</bundles_post_ra>
